<compile_context>
chip_gen: v5e
topology: v5e:2x2
jax: 0.10.0
libtpu: 0.0.40
codegen_flags: <defaults>
</compile_context>

<pallas_src>
import functools

import jax
import jax.numpy as jnp
from jax.experimental import pallas as pl
from jax.experimental.pallas import tpu as pltpu


# ------------------------- patch embedding matmul --------------------------

def _linear_kernel(x_ref, w_ref, b_ref, o_ref):
    """One M-tile of x @ w + b.  bf16 MXU operands, f32 accumulation."""
    x = x_ref[...].astype(jnp.bfloat16)
    w = w_ref[...].astype(jnp.bfloat16)
    y = jnp.dot(x, w, preferred_element_type=jnp.float32)
    y = y + b_ref[...].astype(jnp.float32)
    o_ref[...] = y.astype(o_ref.dtype)


def _pick_tm(m):
    """Largest row tile that divides M (mem-bound stream: bigger is better;
    a single block is fine when M is small)."""
    for t in (512, 256, 128, 64, 32, 16, 8):
        if m % t == 0:
            return t
    return m


def linear(x, w, b):
    """x: (M, K) @ w: (K, N) + b: (1, N) -> bf16 (M, N), M-tiled & pipelined."""
    M, K = x.shape
    N = w.shape[1]
    tm = _pick_tm(M)
    return pl.pallas_call(
        _linear_kernel,
        grid=(M // tm,),
        in_specs=[
            pl.BlockSpec((tm, K), lambda i: (i, 0)),
            pl.BlockSpec((K, N), lambda i: (0, 0)),
            pl.BlockSpec((1, N), lambda i: (0, 0)),
        ],
        out_specs=pl.BlockSpec((tm, N), lambda i: (i, 0)),
        out_shape=jax.ShapeDtypeStruct((M, N), jnp.bfloat16),
        compiler_params=pltpu.CompilerParams(dimension_semantics=("parallel",)),
    )(x, w, b)


# ------------------------- fused encoder tower kernel ----------------------

def _layernorm(x, gb, eps):
    """LayerNorm over the last dim.  x: (S, D) f32, gb: (2, D) [gamma; beta]."""
    g = gb[0:1, :]
    b = gb[1:2, :]
    mean = jnp.mean(x, axis=-1, keepdims=True)
    var = jnp.mean(jnp.square(x - mean), axis=-1, keepdims=True)
    return (x - mean) * jax.lax.rsqrt(var + eps) * g + b


# contract the last axes of both operands (q . k^T without an explicit k.T)
_NT_DIMS = (((1,), (1,)), ((), ()))


def _encoder_kernel(x_ref, pre_gb, ln1, wqkv, bqkv, wo, bo, ln2, w1, b1, w2,
                    b2, out_ref, xact, *, heads, eps, drop_cls):
    """One (batch, layer) grid step of the CLIP encoder.

    The f32 residual stream lives in `xact` (VMEM scratch) and is carried
    across the inner 'arbitrary' layer axis; weights stream in per layer.
    """
    f32, bf16 = jnp.float32, jnp.bfloat16
    l = pl.program_id(1)

    @pl.when(l == 0)
    def _():
        # CLIP pre_layrnorm fused as a prologue; this is hidden_states[0].
        xact[...] = _layernorm(x_ref[0].astype(f32), pre_gb[...], eps)

    x = xact[...]                                   # (S, D) f32 residual
    D = x.shape[-1]
    Dh = D // heads

    # ---- self-attention (pre-LN), fused QKV, one full-K out-projection ----
    h = _layernorm(x, ln1[0].astype(f32), eps)
    qkv = jnp.dot(h.astype(bf16), wqkv[0], preferred_element_type=f32)
    qkv = qkv + bqkv[0].astype(f32)                 # (S, 3D); Q already scaled

    ctx = []
    for hh in range(heads):                         # static unroll over heads
        q_h = qkv[:, hh * Dh:(hh + 1) * Dh].astype(bf16)
        k_h = qkv[:, D + hh * Dh:D + (hh + 1) * Dh].astype(bf16)
        v_h = qkv[:, 2 * D + hh * Dh:2 * D + (hh + 1) * Dh].astype(bf16)
        # q . k^T via dot_general (no XLU transpose of k)
        s = jax.lax.dot_general(q_h, k_h, _NT_DIMS, preferred_element_type=f32)
        s = s - jnp.max(s, axis=-1, keepdims=True)
        p = jnp.exp(s)                              # f32 EUP math (v5e-safe)
        p = p * pl.reciprocal(jnp.sum(p, axis=-1, keepdims=True), approx=True)
        ctx.append(jnp.dot(p.astype(bf16), v_h, preferred_element_type=f32))
    # Lane-contiguous (S, D) context -> ONE (S,D)@(D,D) out-projection matmul.
    ctx = jnp.concatenate(ctx, axis=-1).astype(bf16)
    attn = jnp.dot(ctx, wo[0], preferred_element_type=f32) + bo[0].astype(f32)
    x = x + attn                                    # residual fused

    # ---- MLP (pre-LN), quick_gelu, residual fused --------------------------
    # TODO(synk): I-chunk tiling of w1/w2 is required before CLIP-L scale.
    h2 = _layernorm(x, ln2[0].astype(f32), eps)
    a = jnp.dot(h2.astype(bf16), w1[0], preferred_element_type=f32)
    a = a + b1[0].astype(f32)
    a = a * jax.nn.sigmoid(1.702 * a)               # CLIP quick_gelu, f32 math
    m = jnp.dot(a.astype(bf16), w2[0], preferred_element_type=f32)
    x = x + m + b2[0].astype(f32)

    xact[...] = x                                   # carry to next layer

    @pl.when(l == pl.num_programs(1) - 1)
    def _():
        # feature_select: 'patch' drops the CLS token in-kernel.
        y = x[1:, :] if drop_cls else x
        out_ref[0] = y.astype(out_ref.dtype)


def encoder_tower(x_emb, params, cfg, out_dtype):
    """All selected encoder layers in ONE pallas_call; grid = (batch, layer)."""
    B, S, D = x_emb.shape
    H = cfg["heads"]
    L = params["wqkv"].shape[0]          # number of layers actually executed
    inter = params["w1"].shape[-1]
    if cfg["select_feature"] not in ("patch", "cls_patch"):
        raise ValueError(f"Unexpected select feature: {cfg['select_feature']}")
    drop_cls = cfg["select_feature"] == "patch"
    n_out = S - 1 if drop_cls else S

    def per_layer(shape):
        nd = len(shape)
        return pl.BlockSpec((1,) + shape,
                            lambda b, l, _nd=nd: (l,) + (0,) * _nd)

    def const(shape):
        nd = len(shape)
        return pl.BlockSpec(shape, lambda b, l, _nd=nd: (0,) * _nd)

    in_specs = [
        pl.BlockSpec((1, S, D), lambda b, l: (b, 0, 0)),    # embeddings
        const((2, D)),                                      # pre_layrnorm
        per_layer((2, D)),                                  # ln1
        per_layer((D, 3 * D)), per_layer((1, 3 * D)),       # wqkv, bqkv
        per_layer((D, D)), per_layer((1, D)),               # wo, bo
        per_layer((2, D)),                                  # ln2
        per_layer((D, inter)), per_layer((1, inter)),       # w1, b1
        per_layer((inter, D)), per_layer((1, D)),           # w2, b2
    ]

    return pl.pallas_call(
        functools.partial(_encoder_kernel, heads=H, eps=1e-5,
                          drop_cls=drop_cls),
        grid=(B, L),
        in_specs=in_specs,
        out_specs=pl.BlockSpec((1, n_out, D), lambda b, l: (b, 0, 0)),
        out_shape=jax.ShapeDtypeStruct((B, n_out, D), out_dtype),
        scratch_shapes=[pltpu.VMEM((S, D), jnp.float32)],   # f32 residual stream
        compiler_params=pltpu.CompilerParams(
            # batch shards across TensorCores (v7x); layer axis is a carry.
            dimension_semantics=("parallel", "arbitrary"),
            # headroom for real weight sizes (double-buffered layer stream);
            # harmless at the demo shapes, mandatory before CLIP-L scale.
            vmem_limit_bytes=48 * 1024 * 1024,
        ),
    )(x_emb,
      params["pre_ln_gb"],
      params["ln1_gb"], params["wqkv"], params["bqkv"],
      params["wo"], params["bo"],
      params["ln2_gb"], params["w1"], params["b1"],
      params["w2"], params["b2"])


# --------------------------- synthetic ViT tower ---------------------------

CFG = dict(
    image_size=64,
    patch_size=16,
    channels=3,
    hidden=128,               # multiple of 128 -> lane-dense HBM tensors
    heads=4,
    intermediate=256,
    layers=3,
    select_layer=-2,          # VisionTower default mm_vision_select_layer
    select_feature="patch",   # VisionTower default mm_vision_select_feature
)


def init_params(key, cfg):
    """Synthetic CLIP-ViT weights, already prepped for the fused kernel:
    per-layer weights stacked on a leading layer axis (only the layers needed
    for hidden_states[select_layer]), fused QKV with the attention scale
    folded into the Q columns, bf16 matmul weights, f32 LN params / biases."""
    D = cfg["hidden"]
    C = cfg["channels"]
    p = cfg["patch_size"]
    inter = cfg["intermediate"]
    H = cfg["heads"]
    n_patch = (cfg["image_size"] // p) ** 2
    n_layers = cfg["layers"]
    sel = cfg["select_layer"]
    idx = sel if sel >= 0 else n_layers + 1 + sel
    assert 1 <= idx <= n_layers, "pre_layrnorm is fused into the first layer"
    scale = (D // H) ** -0.5
    std = 0.02

    def nrm(k, shape, dtype=jnp.bfloat16):
        return (std * jax.random.normal(k, shape, dtype=jnp.float32)).astype(dtype)

    def ln_gb():
        return jnp.stack([jnp.ones((D,), jnp.float32),
                          jnp.zeros((D,), jnp.float32)])     # (2, D)

    keys = jax.random.split(key, 3 + n_layers)
    params = {
        # Conv2d(C, D, kernel=p, stride=p) flattened to (C*p*p, D); must match
        # the (B, gh, gw, C, p, p) im2col ordering used in the forward pass.
        "patch_w": nrm(keys[0], (C * p * p, D)),
        "patch_b": jnp.zeros((1, D), jnp.float32),
        "cls": nrm(keys[1], (1, D), jnp.float32),
        "pos": nrm(keys[2], (n_patch + 1, D), jnp.float32),
        "pre_ln_gb": ln_gb(),
    }

    stacks = {k: [] for k in ("ln1_gb", "wqkv", "bqkv", "wo", "bo",
                              "ln2_gb", "w1", "b1", "w2", "b2")}
    for li in range(idx):                 # dead layers (>= idx) never built
        lk = jax.random.split(keys[3 + li], 6)
        wq = nrm(lk[0], (D, D), jnp.float32) * scale   # fold softmax scale
        wk = nrm(lk[1], (D, D), jnp.float32)
        wv = nrm(lk[2], (D, D), jnp.float32)
        stacks["ln1_gb"].append(ln_gb())
        stacks["wqkv"].append(
            jnp.concatenate([wq, wk, wv], axis=1).astype(jnp.bfloat16))
        stacks["bqkv"].append(jnp.zeros((1, 3 * D), jnp.float32))
        stacks["wo"].append(nrm(lk[3], (D, D)))
        stacks["bo"].append(jnp.zeros((1, D), jnp.float32))
        stacks["ln2_gb"].append(ln_gb())
        stacks["w1"].append(nrm(lk[4], (D, inter)))
        stacks["b1"].append(jnp.zeros((1, inter), jnp.float32))
        stacks["w2"].append(nrm(lk[5], (inter, D)))
        stacks["b2"].append(jnp.zeros((1, D), jnp.float32))
    for k, v in stacks.items():
        params[k] = jnp.stack(v)
    return params


def vision_tower_dynamic_s2_forward(images, params, cfg):
    """Equivalent of VisionTowerDynamicS2.forward (non-list input)."""
    B, C, Himg, Wimg = images.shape
    p = cfg["patch_size"]
    D = cfg["hidden"]
    gh, gw = Himg // p, Wimg // p
    n_patch = gh * gw

    # Patch embedding: Conv2d(C, D, kernel=p, stride=p) as a Pallas matmul.
    # im2col runs in bf16 to halve HBM traffic of this memory-bound stream.
    x = images.astype(jnp.bfloat16)
    x = x.reshape(B, C, gh, p, gw, p).transpose(0, 2, 4, 1, 3, 5)
    x = x.reshape(B * n_patch, C * p * p)
    x = linear(x, params["patch_w"], params["patch_b"])            # bf16
    x = x.reshape(B, n_patch, D).astype(jnp.float32)

    # CLS token + position embeddings (tiny one-time XLA glue).
    cls = jnp.broadcast_to(params["cls"][None], (B, 1, D))
    x = jnp.concatenate([cls, x], axis=1) + params["pos"][None]    # (B, S, D)

    # Encoder: all needed layers (select_layer=-2 => first layers-1) in ONE
    # pallas_call; pre_layrnorm is the layer-0 prologue, CLS dropped in-kernel.
    return encoder_tower(x, params, cfg, out_dtype=images.dtype)


# --------------------------------- driver ----------------------------------

if __name__ == "__main__":
    key = jax.random.PRNGKey(0)
    pkey, xkey = jax.random.split(key)

    params = init_params(pkey, CFG)
    images = jax.random.normal(
        xkey,
        (2, CFG["channels"], CFG["image_size"], CFG["image_size"]),
        dtype=jnp.float32,
    )

    fwd = jax.jit(functools.partial(vision_tower_dynamic_s2_forward, cfg=CFG))
    out = fwd(images, params)
    out = jax.block_until_ready(out)

    n_patch = (CFG["image_size"] // CFG["patch_size"]) ** 2
    assert out.shape == (2, n_patch, CFG["hidden"]), out.shape
    assert out.dtype == images.dtype
    assert bool(jnp.all(jnp.isfinite(out)))
    print("KERNEL_OK")
</pallas_src>

<mosaic_0001>
module attributes {stable_mosaic.version = 11 : i64} {
  func.func @_linear_kernel(%arg0: i32, %arg1: memref<32x768xbf16, #tpu.memory_space<vmem>>, %arg2: memref<768x128xbf16, #tpu.memory_space<vmem>>, %arg3: memref<1x128xf32, #tpu.memory_space<vmem>>, %arg4: memref<32x128xbf16, #tpu.memory_space<vmem>>) attributes {dimension_semantics = [#tpu.dimension_semantics<parallel>], iteration_bounds = array<i64: 1>, scalar_prefetch = 0 : i64, scratch_operands = 0 : i64, tpu.core_type = #tpu.core_type<tc>, window_params = [{transform_indices = @transform_0, window_bounds = array<i64: 32, 768>}, {pipeline_mode = #tpu.pipeline_mode<synchronous>, transform_indices = @transform_1, window_bounds = array<i64: 768, 128>}, {pipeline_mode = #tpu.pipeline_mode<synchronous>, transform_indices = @transform_2, window_bounds = array<i64: 1, 128>}, {transform_indices = @transform_3, window_bounds = array<i64: 32, 128>}]} {
    %c0 = arith.constant 0 : index
    %c0_0 = arith.constant 0 : index
    %0 = vector.load %arg1[%c0, %c0_0] : memref<32x768xbf16, #tpu.memory_space<vmem>>, vector<32x768xbf16>
    %c0_1 = arith.constant 0 : index
    %c0_2 = arith.constant 0 : index
    %1 = vector.load %arg2[%c0_1, %c0_2] : memref<768x128xbf16, #tpu.memory_space<vmem>>, vector<768x128xbf16>
    %cst = arith.constant dense<0.000000e+00> : vector<32x128xf32>
    %2 = tpu.matmul %0, %1, %cst {dimension_numbers = #tpu.dot_dimension_numbers<[1], [0], [0], [1], [0, 0, 1, 1], [], []>} : vector<32x768xbf16>, vector<768x128xbf16>, vector<32x128xf32> -> vector<32x128xf32>
    %c0_3 = arith.constant 0 : index
    %c0_4 = arith.constant 0 : index
    %3 = vector.load %arg3[%c0_3, %c0_4] : memref<1x128xf32, #tpu.memory_space<vmem>>, vector<1x128xf32>
    %4 = vector.broadcast %3 : vector<1x128xf32> to vector<32x128xf32>
    %5 = arith.addf %2, %4 : vector<32x128xf32>
    %6 = arith.truncf %5 : vector<32x128xf32> to vector<32x128xbf16>
    %c0_5 = arith.constant 0 : index
    %c0_6 = arith.constant 0 : index
    %7 = vector.load %arg4[%c0_5, %c0_6] : memref<32x128xbf16, #tpu.memory_space<vmem>>, vector<32x128xbf16>
    tpu.vector_store %arg4[%c0_5, %c0_6], %6 {strides = array<i32>} : memref<32x128xbf16, #tpu.memory_space<vmem>>, vector<32x128xbf16>,
    return
  }
  func.func @transform_0(%arg0: i32) -> (i32, i32) {
    %c0_i32 = arith.constant 0 : i32
    %c0_i32_0 = arith.constant 0 : i32
    return %arg0, %c0_i32 : i32, i32
  }
  func.func @transform_1(%arg0: i32) -> (i32, i32) {
    %c0_i32 = arith.constant 0 : i32
    %c0_i32_0 = arith.constant 0 : i32
    %c0_i32_1 = arith.constant 0 : i32
    return %c0_i32, %c0_i32_0 : i32, i32
  }
  func.func @transform_2(%arg0: i32) -> (i32, i32) {
    %c0_i32 = arith.constant 0 : i32
    %c0_i32_0 = arith.constant 0 : i32
    %c0_i32_1 = arith.constant 0 : i32
    return %c0_i32, %c0_i32_0 : i32, i32
  }
  func.func @transform_3(%arg0: i32) -> (i32, i32) {
    %c0_i32 = arith.constant 0 : i32
    %c0_i32_0 = arith.constant 0 : i32
    return %arg0, %c0_i32 : i32, i32
  }
}

module attributes {stable_mosaic.version = 11 : i64} {
  func.func @_encoder_kernel(%arg0: i32, %arg1: i32, %arg2: memref<1x17x128xf32, #tpu.memory_space<vmem>>, %arg3: memref<2x128xf32, #tpu.memory_space<vmem>>, %arg4: memref<1x2x128xf32, #tpu.memory_space<vmem>>, %arg5: memref<1x128x384xbf16, #tpu.memory_space<vmem>>, %arg6: memref<1x1x384xf32, #tpu.memory_space<vmem>>, %arg7: memref<1x128x128xbf16, #tpu.memory_space<vmem>>, %arg8: memref<1x1x128xf32, #tpu.memory_space<vmem>>, %arg9: memref<1x2x128xf32, #tpu.memory_space<vmem>>, %arg10: memref<1x128x256xbf16, #tpu.memory_space<vmem>>, %arg11: memref<1x1x256xf32, #tpu.memory_space<vmem>>, %arg12: memref<1x256x128xbf16, #tpu.memory_space<vmem>>, %arg13: memref<1x1x128xf32, #tpu.memory_space<vmem>>, %arg14: memref<1x16x128xf32, #tpu.memory_space<vmem>>, %arg15: memref<17x128xf32, #tpu.memory_space<vmem>>) attributes {dimension_semantics = [#tpu.dimension_semantics<parallel>, #tpu.dimension_semantics<arbitrary>], iteration_bounds = array<i64: 2, 2>, scalar_prefetch = 0 : i64, scratch_operands = 1 : i64, tpu.core_type = #tpu.core_type<tc>, window_params = [{transform_indices = @transform_0, window_bounds = array<i64: 1, 17, 128>}, {pipeline_mode = #tpu.pipeline_mode<synchronous>, transform_indices = @transform_1, window_bounds = array<i64: 2, 128>}, {transform_indices = @transform_2, window_bounds = array<i64: 1, 2, 128>}, {transform_indices = @transform_3, window_bounds = array<i64: 1, 128, 384>}, {transform_indices = @transform_4, window_bounds = array<i64: 1, 1, 384>}, {transform_indices = @transform_5, window_bounds = array<i64: 1, 128, 128>}, {transform_indices = @transform_6, window_bounds = array<i64: 1, 1, 128>}, {transform_indices = @transform_7, window_bounds = array<i64: 1, 2, 128>}, {transform_indices = @transform_8, window_bounds = array<i64: 1, 128, 256>}, {transform_indices = @transform_9, window_bounds = array<i64: 1, 1, 256>}, {transform_indices = @transform_10, window_bounds = array<i64: 1, 256, 128>}, {transform_indices = @transform_11, window_bounds = array<i64: 1, 1, 128>}, {transform_indices = @transform_12, window_bounds = array<i64: 1, 16, 128>}]} {
    %c0_i32 = arith.constant 0 : i32
    %0 = arith.cmpi eq, %arg1, %c0_i32 : i32
    %1 = arith.extui %0 : i1 to i32
    %c0_i32_0 = arith.constant 0 : i32
    %2 = arith.cmpi ne, %1, %c0_i32_0 : i32
    scf.if %2 {
      %c0_66 = arith.constant 0 : index
      %c0_67 = arith.constant 0 : index
      %c0_68 = arith.constant 0 : index
      %179 = vector.load %arg2[%c0_66, %c0_67, %c0_68] : memref<1x17x128xf32, #tpu.memory_space<vmem>>, vector<1x17x128xf32>
      %180 = vector.shape_cast %179 : vector<1x17x128xf32> to vector<17x128xf32>
      %c0_69 = arith.constant 0 : index
      %c0_70 = arith.constant 0 : index
      %181 = vector.load %arg3[%c0_69, %c0_70] : memref<2x128xf32, #tpu.memory_space<vmem>>, vector<2x128xf32>
      %182 = vector.extract_strided_slice %181 {offsets = [0, 0], sizes = [1, 128], strides = [1, 1]} : vector<2x128xf32> to vector<1x128xf32>
      %183 = vector.extract_strided_slice %181 {offsets = [1, 0], sizes = [1, 128], strides = [1, 1]} : vector<2x128xf32> to vector<1x128xf32>
      %cst_71 = arith.constant dense<0.000000e+00> : vector<17xf32>
      %184 = vector.multi_reduction <add>, %180, %cst_71 [1] : vector<17x128xf32> to vector<17xf32>
      %185 = vector.shape_cast %184 : vector<17xf32> to vector<17x1xf32>
      %cst_72 = arith.constant 1.280000e+02 : f32
      %186 = vector.broadcast %cst_72 : f32 to vector<17x1xf32>
      %187 = arith.divf %185, %186 : vector<17x1xf32>
      %188 = vector.broadcast %187 : vector<17x1xf32> to vector<17x128xf32>
      %189 = arith.subf %180, %188 : vector<17x128xf32>
      %190 = arith.mulf %189, %189 : vector<17x128xf32>
      %cst_73 = arith.constant dense<0.000000e+00> : vector<17xf32>
      %191 = vector.multi_reduction <add>, %190, %cst_73 [1] : vector<17x128xf32> to vector<17xf32>
      %192 = vector.shape_cast %191 : vector<17xf32> to vector<17x1xf32>
      %cst_74 = arith.constant 1.280000e+02 : f32
      %193 = vector.broadcast %cst_74 : f32 to vector<17x1xf32>
      %194 = arith.divf %192, %193 : vector<17x1xf32>
      %195 = vector.broadcast %187 : vector<17x1xf32> to vector<17x128xf32>
      %196 = arith.subf %180, %195 : vector<17x128xf32>
      %cst_75 = arith.constant 9.99999974E-6 : f32
      %197 = vector.broadcast %cst_75 : f32 to vector<17x1xf32>
      %198 = arith.addf %194, %197 : vector<17x1xf32>
      %199 = math.rsqrt %198 : vector<17x1xf32>
      %200 = vector.broadcast %199 : vector<17x1xf32> to vector<17x128xf32>
      %201 = arith.mulf %196, %200 : vector<17x128xf32>
      %202 = vector.broadcast %182 : vector<1x128xf32> to vector<17x128xf32>
      %203 = arith.mulf %201, %202 : vector<17x128xf32>
      %204 = vector.broadcast %183 : vector<1x128xf32> to vector<17x128xf32>
      %205 = arith.addf %203, %204 : vector<17x128xf32>
      %c0_76 = arith.constant 0 : index
      %c0_77 = arith.constant 0 : index
      %206 = vector.load %arg15[%c0_76, %c0_77] : memref<17x128xf32, #tpu.memory_space<vmem>>, vector<17x128xf32>
      tpu.vector_store %arg15[%c0_76, %c0_77], %205 {strides = array<i32>} : memref<17x128xf32, #tpu.memory_space<vmem>>, vector<17x128xf32>,
    } else {
    }
    %c0 = arith.constant 0 : index
    %c0_1 = arith.constant 0 : index
    %3 = vector.load %arg15[%c0, %c0_1] : memref<17x128xf32, #tpu.memory_space<vmem>>, vector<17x128xf32>
    %c0_2 = arith.constant 0 : index
    %c0_3 = arith.constant 0 : index
    %c0_4 = arith.constant 0 : index
    %4 = vector.load %arg4[%c0_2, %c0_3, %c0_4] : memref<1x2x128xf32, #tpu.memory_space<vmem>>, vector<1x2x128xf32>
    %5 = vector.shape_cast %4 : vector<1x2x128xf32> to vector<2x128xf32>
    %6 = vector.extract_strided_slice %5 {offsets = [0, 0], sizes = [1, 128], strides = [1, 1]} : vector<2x128xf32> to vector<1x128xf32>
    %7 = vector.extract_strided_slice %5 {offsets = [1, 0], sizes = [1, 128], strides = [1, 1]} : vector<2x128xf32> to vector<1x128xf32>
    %cst = arith.constant dense<0.000000e+00> : vector<17xf32>
    %8 = vector.multi_reduction <add>, %3, %cst [1] : vector<17x128xf32> to vector<17xf32>
    %9 = vector.shape_cast %8 : vector<17xf32> to vector<17x1xf32>
    %cst_5 = arith.constant 1.280000e+02 : f32
    %10 = vector.broadcast %cst_5 : f32 to vector<17x1xf32>
    %11 = arith.divf %9, %10 : vector<17x1xf32>
    %12 = vector.broadcast %11 : vector<17x1xf32> to vector<17x128xf32>
    %13 = arith.subf %3, %12 : vector<17x128xf32>
    %14 = arith.mulf %13, %13 : vector<17x128xf32>
    %cst_6 = arith.constant dense<0.000000e+00> : vector<17xf32>
    %15 = vector.multi_reduction <add>, %14, %cst_6 [1] : vector<17x128xf32> to vector<17xf32>
    %16 = vector.shape_cast %15 : vector<17xf32> to vector<17x1xf32>
    %cst_7 = arith.constant 1.280000e+02 : f32
    %17 = vector.broadcast %cst_7 : f32 to vector<17x1xf32>
    %18 = arith.divf %16, %17 : vector<17x1xf32>
    %19 = vector.broadcast %11 : vector<17x1xf32> to vector<17x128xf32>
    %20 = arith.subf %3, %19 : vector<17x128xf32>
    %cst_8 = arith.constant 9.99999974E-6 : f32
    %21 = vector.broadcast %cst_8 : f32 to vector<17x1xf32>
    %22 = arith.addf %18, %21 : vector<17x1xf32>
    %23 = math.rsqrt %22 : vector<17x1xf32>
    %24 = vector.broadcast %23 : vector<17x1xf32> to vector<17x128xf32>
    %25 = arith.mulf %20, %24 : vector<17x128xf32>
    %26 = vector.broadcast %6 : vector<1x128xf32> to vector<17x128xf32>
    %27 = arith.mulf %25, %26 : vector<17x128xf32>
    %28 = vector.broadcast %7 : vector<1x128xf32> to vector<17x128xf32>
    %29 = arith.addf %27, %28 : vector<17x128xf32>
    %30 = arith.truncf %29 : vector<17x128xf32> to vector<17x128xbf16>
    %c0_9 = arith.constant 0 : index
    %c0_10 = arith.constant 0 : index
    %c0_11 = arith.constant 0 : index
    %31 = vector.load %arg5[%c0_9, %c0_10, %c0_11] : memref<1x128x384xbf16, #tpu.memory_space<vmem>>, vector<1x128x384xbf16>
    %32 = vector.shape_cast %31 : vector<1x128x384xbf16> to vector<128x384xbf16>
    %cst_12 = arith.constant dense<0.000000e+00> : vector<17x384xf32>
    %33 = tpu.matmul %30, %32, %cst_12 {dimension_numbers = #tpu.dot_dimension_numbers<[1], [0], [0], [1], [0, 0, 1, 1], [], []>} : vector<17x128xbf16>, vector<128x384xbf16>, vector<17x384xf32> -> vector<17x384xf32>
    %c0_13 = arith.constant 0 : index
    %c0_14 = arith.constant 0 : index
    %c0_15 = arith.constant 0 : index
    %34 = vector.load %arg6[%c0_13, %c0_14, %c0_15] : memref<1x1x384xf32, #tpu.memory_space<vmem>>, vector<1x1x384xf32>
    %35 = vector.shape_cast %34 : vector<1x1x384xf32> to vector<1x384xf32>
    %36 = vector.broadcast %35 : vector<1x384xf32> to vector<17x384xf32>
    %37 = arith.addf %33, %36 : vector<17x384xf32>
    %38 = vector.extract_strided_slice %37 {offsets = [0, 0], sizes = [17, 32], strides = [1, 1]} : vector<17x384xf32> to vector<17x32xf32>
    %39 = arith.truncf %38 : vector<17x32xf32> to vector<17x32xbf16>
    %40 = vector.extract_strided_slice %37 {offsets = [0, 128], sizes = [17, 32], strides = [1, 1]} : vector<17x384xf32> to vector<17x32xf32>
    %41 = arith.truncf %40 : vector<17x32xf32> to vector<17x32xbf16>
    %42 = vector.extract_strided_slice %37 {offsets = [0, 256], sizes = [17, 32], strides = [1, 1]} : vector<17x384xf32> to vector<17x32xf32>
    %43 = arith.truncf %42 : vector<17x32xf32> to vector<17x32xbf16>
    %cst_16 = arith.constant dense<0.000000e+00> : vector<17x17xf32>
    %44 = tpu.matmul %39, %41, %cst_16 {dimension_numbers = #tpu.dot_dimension_numbers<[1], [1], [0], [0], [0, 0, 1, 0], [], []>} : vector<17x32xbf16>, vector<17x32xbf16>, vector<17x17xf32> -> vector<17x17xf32>
    %cst_17 = arith.constant dense<0xFF800000> : vector<17xf32>
    %45 = vector.multi_reduction <maximumf>, %44, %cst_17 [1] : vector<17x17xf32> to vector<17xf32>
    %46 = vector.shape_cast %45 : vector<17xf32> to vector<17x1xf32>
    %47 = vector.broadcast %46 : vector<17x1xf32> to vector<17x17xf32>
    %48 = arith.subf %44, %47 : vector<17x17xf32>
    %49 = math.exp %48 : vector<17x17xf32>
    %cst_18 = arith.constant dense<0.000000e+00> : vector<17xf32>
    %50 = vector.multi_reduction <add>, %49, %cst_18 [1] : vector<17x17xf32> to vector<17xf32>
    %51 = vector.shape_cast %50 : vector<17xf32> to vector<17x1xf32>
    %52 = tpu.reciprocal %51 {approx = true} : vector<17x1xf32> -> vector<17x1xf32>
    %53 = vector.broadcast %52 : vector<17x1xf32> to vector<17x17xf32>
    %54 = arith.mulf %49, %53 : vector<17x17xf32>
    %55 = arith.truncf %54 : vector<17x17xf32> to vector<17x17xbf16>
    %cst_19 = arith.constant dense<0.000000e+00> : vector<17x32xf32>
    %56 = tpu.matmul %55, %43, %cst_19 {dimension_numbers = #tpu.dot_dimension_numbers<[1], [0], [0], [1], [0, 0, 1, 1], [], []>} : vector<17x17xbf16>, vector<17x32xbf16>, vector<17x32xf32> -> vector<17x32xf32>
    %57 = vector.extract_strided_slice %37 {offsets = [0, 32], sizes = [17, 32], strides = [1, 1]} : vector<17x384xf32> to vector<17x32xf32>
    %58 = arith.truncf %57 : vector<17x32xf32> to vector<17x32xbf16>
    %59 = vector.extract_strided_slice %37 {offsets = [0, 160], sizes = [17, 32], strides = [1, 1]} : vector<17x384xf32> to vector<17x32xf32>
    %60 = arith.truncf %59 : vector<17x32xf32> to vector<17x32xbf16>
    %61 = vector.extract_strided_slice %37 {offsets = [0, 288], sizes = [17, 32], strides = [1, 1]} : vector<17x384xf32> to vector<17x32xf32>
    %62 = arith.truncf %61 : vector<17x32xf32> to vector<17x32xbf16>
    %cst_20 = arith.constant dense<0.000000e+00> : vector<17x17xf32>
    %63 = tpu.matmul %58, %60, %cst_20 {dimension_numbers = #tpu.dot_dimension_numbers<[1], [1], [0], [0], [0, 0, 1, 0], [], []>} : vector<17x32xbf16>, vector<17x32xbf16>, vector<17x17xf32> -> vector<17x17xf32>
    %cst_21 = arith.constant dense<0xFF800000> : vector<17xf32>
    %64 = vector.multi_reduction <maximumf>, %63, %cst_21 [1] : vector<17x17xf32> to vector<17xf32>
    %65 = vector.shape_cast %64 : vector<17xf32> to vector<17x1xf32>
    %66 = vector.broadcast %65 : vector<17x1xf32> to vector<17x17xf32>
    %67 = arith.subf %63, %66 : vector<17x17xf32>
    %68 = math.exp %67 : vector<17x17xf32>
    %cst_22 = arith.constant dense<0.000000e+00> : vector<17xf32>
    %69 = vector.multi_reduction <add>, %68, %cst_22 [1] : vector<17x17xf32> to vector<17xf32>
    %70 = vector.shape_cast %69 : vector<17xf32> to vector<17x1xf32>
    %71 = tpu.reciprocal %70 {approx = true} : vector<17x1xf32> -> vector<17x1xf32>
    %72 = vector.broadcast %71 : vector<17x1xf32> to vector<17x17xf32>
    %73 = arith.mulf %68, %72 : vector<17x17xf32>
    %74 = arith.truncf %73 : vector<17x17xf32> to vector<17x17xbf16>
    %cst_23 = arith.constant dense<0.000000e+00> : vector<17x32xf32>
    %75 = tpu.matmul %74, %62, %cst_23 {dimension_numbers = #tpu.dot_dimension_numbers<[1], [0], [0], [1], [0, 0, 1, 1], [], []>} : vector<17x17xbf16>, vector<17x32xbf16>, vector<17x32xf32> -> vector<17x32xf32>
    %76 = vector.extract_strided_slice %37 {offsets = [0, 64], sizes = [17, 32], strides = [1, 1]} : vector<17x384xf32> to vector<17x32xf32>
    %77 = arith.truncf %76 : vector<17x32xf32> to vector<17x32xbf16>
    %78 = vector.extract_strided_slice %37 {offsets = [0, 192], sizes = [17, 32], strides = [1, 1]} : vector<17x384xf32> to vector<17x32xf32>
    %79 = arith.truncf %78 : vector<17x32xf32> to vector<17x32xbf16>
    %80 = vector.extract_strided_slice %37 {offsets = [0, 320], sizes = [17, 32], strides = [1, 1]} : vector<17x384xf32> to vector<17x32xf32>
    %81 = arith.truncf %80 : vector<17x32xf32> to vector<17x32xbf16>
    %cst_24 = arith.constant dense<0.000000e+00> : vector<17x17xf32>
    %82 = tpu.matmul %77, %79, %cst_24 {dimension_numbers = #tpu.dot_dimension_numbers<[1], [1], [0], [0], [0, 0, 1, 0], [], []>} : vector<17x32xbf16>, vector<17x32xbf16>, vector<17x17xf32> -> vector<17x17xf32>
    %cst_25 = arith.constant dense<0xFF800000> : vector<17xf32>
    %83 = vector.multi_reduction <maximumf>, %82, %cst_25 [1] : vector<17x17xf32> to vector<17xf32>
    %84 = vector.shape_cast %83 : vector<17xf32> to vector<17x1xf32>
    %85 = vector.broadcast %84 : vector<17x1xf32> to vector<17x17xf32>
    %86 = arith.subf %82, %85 : vector<17x17xf32>
    %87 = math.exp %86 : vector<17x17xf32>
    %cst_26 = arith.constant dense<0.000000e+00> : vector<17xf32>
    %88 = vector.multi_reduction <add>, %87, %cst_26 [1] : vector<17x17xf32> to vector<17xf32>
    %89 = vector.shape_cast %88 : vector<17xf32> to vector<17x1xf32>
    %90 = tpu.reciprocal %89 {approx = true} : vector<17x1xf32> -> vector<17x1xf32>
    %91 = vector.broadcast %90 : vector<17x1xf32> to vector<17x17xf32>
    %92 = arith.mulf %87, %91 : vector<17x17xf32>
    %93 = arith.truncf %92 : vector<17x17xf32> to vector<17x17xbf16>
    %cst_27 = arith.constant dense<0.000000e+00> : vector<17x32xf32>
    %94 = tpu.matmul %93, %81, %cst_27 {dimension_numbers = #tpu.dot_dimension_numbers<[1], [0], [0], [1], [0, 0, 1, 1], [], []>} : vector<17x17xbf16>, vector<17x32xbf16>, vector<17x32xf32> -> vector<17x32xf32>
    %95 = vector.extract_strided_slice %37 {offsets = [0, 96], sizes = [17, 32], strides = [1, 1]} : vector<17x384xf32> to vector<17x32xf32>
    %96 = arith.truncf %95 : vector<17x32xf32> to vector<17x32xbf16>
    %97 = vector.extract_strided_slice %37 {offsets = [0, 224], sizes = [17, 32], strides = [1, 1]} : vector<17x384xf32> to vector<17x32xf32>
    %98 = arith.truncf %97 : vector<17x32xf32> to vector<17x32xbf16>
    %99 = vector.extract_strided_slice %37 {offsets = [0, 352], sizes = [17, 32], strides = [1, 1]} : vector<17x384xf32> to vector<17x32xf32>
    %100 = arith.truncf %99 : vector<17x32xf32> to vector<17x32xbf16>
    %cst_28 = arith.constant dense<0.000000e+00> : vector<17x17xf32>
    %101 = tpu.matmul %96, %98, %cst_28 {dimension_numbers = #tpu.dot_dimension_numbers<[1], [1], [0], [0], [0, 0, 1, 0], [], []>} : vector<17x32xbf16>, vector<17x32xbf16>, vector<17x17xf32> -> vector<17x17xf32>
    %cst_29 = arith.constant dense<0xFF800000> : vector<17xf32>
    %102 = vector.multi_reduction <maximumf>, %101, %cst_29 [1] : vector<17x17xf32> to vector<17xf32>
    %103 = vector.shape_cast %102 : vector<17xf32> to vector<17x1xf32>
    %104 = vector.broadcast %103 : vector<17x1xf32> to vector<17x17xf32>
    %105 = arith.subf %101, %104 : vector<17x17xf32>
    %106 = math.exp %105 : vector<17x17xf32>
    %cst_30 = arith.constant dense<0.000000e+00> : vector<17xf32>
    %107 = vector.multi_reduction <add>, %106, %cst_30 [1] : vector<17x17xf32> to vector<17xf32>
    %108 = vector.shape_cast %107 : vector<17xf32> to vector<17x1xf32>
    %109 = tpu.reciprocal %108 {approx = true} : vector<17x1xf32> -> vector<17x1xf32>
    %110 = vector.broadcast %109 : vector<17x1xf32> to vector<17x17xf32>
    %111 = arith.mulf %106, %110 : vector<17x17xf32>
    %112 = arith.truncf %111 : vector<17x17xf32> to vector<17x17xbf16>
    %cst_31 = arith.constant dense<0.000000e+00> : vector<17x32xf32>
    %113 = tpu.matmul %112, %100, %cst_31 {dimension_numbers = #tpu.dot_dimension_numbers<[1], [0], [0], [1], [0, 0, 1, 1], [], []>} : vector<17x17xbf16>, vector<17x32xbf16>, vector<17x32xf32> -> vector<17x32xf32>
    %114 = tpu.concatenate %56, %75, %94, %113 in 1 : vector<17x32xf32>, vector<17x32xf32>, vector<17x32xf32>, vector<17x32xf32> -> vector<17x128xf32>
    %115 = arith.truncf %114 : vector<17x128xf32> to vector<17x128xbf16>
    %c0_32 = arith.constant 0 : index
    %c0_33 = arith.constant 0 : index
    %c0_34 = arith.constant 0 : index
    %116 = vector.load %arg7[%c0_32, %c0_33, %c0_34] : memref<1x128x128xbf16, #tpu.memory_space<vmem>>, vector<1x128x128xbf16>
    %117 = vector.shape_cast %116 : vector<1x128x128xbf16> to vector<128x128xbf16>
    %cst_35 = arith.constant dense<0.000000e+00> : vector<17x128xf32>
    %118 = tpu.matmul %115, %117, %cst_35 {dimension_numbers = #tpu.dot_dimension_numbers<[1], [0], [0], [1], [0, 0, 1, 1], [], []>} : vector<17x128xbf16>, vector<128x128xbf16>, vector<17x128xf32> -> vector<17x128xf32>
    %c0_36 = arith.constant 0 : index
    %c0_37 = arith.constant 0 : index
    %c0_38 = arith.constant 0 : index
    %119 = vector.load %arg8[%c0_36, %c0_37, %c0_38] : memref<1x1x128xf32, #tpu.memory_space<vmem>>, vector<1x1x128xf32>
    %120 = vector.shape_cast %119 : vector<1x1x128xf32> to vector<1x128xf32>
    %121 = vector.broadcast %120 : vector<1x128xf32> to vector<17x128xf32>
    %122 = arith.addf %118, %121 : vector<17x128xf32>
    %123 = arith.addf %3, %122 : vector<17x128xf32>
    %c0_39 = arith.constant 0 : index
    %c0_40 = arith.constant 0 : index
    %c0_41 = arith.constant 0 : index
    %124 = vector.load %arg9[%c0_39, %c0_40, %c0_41] : memref<1x2x128xf32, #tpu.memory_space<vmem>>, vector<1x2x128xf32>
    %125 = vector.shape_cast %124 : vector<1x2x128xf32> to vector<2x128xf32>
    %126 = vector.extract_strided_slice %125 {offsets = [0, 0], sizes = [1, 128], strides = [1, 1]} : vector<2x128xf32> to vector<1x128xf32>
    %127 = vector.extract_strided_slice %125 {offsets = [1, 0], sizes = [1, 128], strides = [1, 1]} : vector<2x128xf32> to vector<1x128xf32>
    %cst_42 = arith.constant dense<0.000000e+00> : vector<17xf32>
    %128 = vector.multi_reduction <add>, %123, %cst_42 [1] : vector<17x128xf32> to vector<17xf32>
    %129 = vector.shape_cast %128 : vector<17xf32> to vector<17x1xf32>
    %cst_43 = arith.constant 1.280000e+02 : f32
    %130 = vector.broadcast %cst_43 : f32 to vector<17x1xf32>
    %131 = arith.divf %129, %130 : vector<17x1xf32>
    %132 = vector.broadcast %131 : vector<17x1xf32> to vector<17x128xf32>
    %133 = arith.subf %123, %132 : vector<17x128xf32>
    %134 = arith.mulf %133, %133 : vector<17x128xf32>
    %cst_44 = arith.constant dense<0.000000e+00> : vector<17xf32>
    %135 = vector.multi_reduction <add>, %134, %cst_44 [1] : vector<17x128xf32> to vector<17xf32>
    %136 = vector.shape_cast %135 : vector<17xf32> to vector<17x1xf32>
    %cst_45 = arith.constant 1.280000e+02 : f32
    %137 = vector.broadcast %cst_45 : f32 to vector<17x1xf32>
    %138 = arith.divf %136, %137 : vector<17x1xf32>
    %139 = vector.broadcast %131 : vector<17x1xf32> to vector<17x128xf32>
    %140 = arith.subf %123, %139 : vector<17x128xf32>
    %cst_46 = arith.constant 9.99999974E-6 : f32
    %141 = vector.broadcast %cst_46 : f32 to vector<17x1xf32>
    %142 = arith.addf %138, %141 : vector<17x1xf32>
    %143 = math.rsqrt %142 : vector<17x1xf32>
    %144 = vector.broadcast %143 : vector<17x1xf32> to vector<17x128xf32>
    %145 = arith.mulf %140, %144 : vector<17x128xf32>
    %146 = vector.broadcast %126 : vector<1x128xf32> to vector<17x128xf32>
    %147 = arith.mulf %145, %146 : vector<17x128xf32>
    %148 = vector.broadcast %127 : vector<1x128xf32> to vector<17x128xf32>
    %149 = arith.addf %147, %148 : vector<17x128xf32>
    %150 = arith.truncf %149 : vector<17x128xf32> to vector<17x128xbf16>
    %c0_47 = arith.constant 0 : index
    %c0_48 = arith.constant 0 : index
    %c0_49 = arith.constant 0 : index
    %151 = vector.load %arg10[%c0_47, %c0_48, %c0_49] : memref<1x128x256xbf16, #tpu.memory_space<vmem>>, vector<1x128x256xbf16>
    %152 = vector.shape_cast %151 : vector<1x128x256xbf16> to vector<128x256xbf16>
    %cst_50 = arith.constant dense<0.000000e+00> : vector<17x256xf32>
    %153 = tpu.matmul %150, %152, %cst_50 {dimension_numbers = #tpu.dot_dimension_numbers<[1], [0], [0], [1], [0, 0, 1, 1], [], []>} : vector<17x128xbf16>, vector<128x256xbf16>, vector<17x256xf32> -> vector<17x256xf32>
    %c0_51 = arith.constant 0 : index
    %c0_52 = arith.constant 0 : index
    %c0_53 = arith.constant 0 : index
    %154 = vector.load %arg11[%c0_51, %c0_52, %c0_53] : memref<1x1x256xf32, #tpu.memory_space<vmem>>, vector<1x1x256xf32>
    %155 = vector.shape_cast %154 : vector<1x1x256xf32> to vector<1x256xf32>
    %156 = vector.broadcast %155 : vector<1x256xf32> to vector<17x256xf32>
    %157 = arith.addf %153, %156 : vector<17x256xf32>
    %cst_54 = arith.constant 1.702000e+00 : f32
    %158 = vector.broadcast %cst_54 : f32 to vector<17x256xf32>
    %159 = arith.mulf %158, %157 : vector<17x256xf32>
    %160 = arith.negf %159 : vector<17x256xf32>
    %161 = math.exp %160 : vector<17x256xf32>
    %cst_55 = arith.constant 1.000000e+00 : f32
    %162 = vector.broadcast %cst_55 : f32 to vector<17x256xf32>
    %163 = arith.addf %162, %161 : vector<17x256xf32>
    %164 = arith.divf %162, %163 : vector<17x256xf32>
    %165 = arith.mulf %157, %164 : vector<17x256xf32>
    %166 = arith.truncf %165 : vector<17x256xf32> to vector<17x256xbf16>
    %c0_56 = arith.constant 0 : index
    %c0_57 = arith.constant 0 : index
    %c0_58 = arith.constant 0 : index
    %167 = vector.load %arg12[%c0_56, %c0_57, %c0_58] : memref<1x256x128xbf16, #tpu.memory_space<vmem>>, vector<1x256x128xbf16>
    %168 = vector.shape_cast %167 : vector<1x256x128xbf16> to vector<256x128xbf16>
    %cst_59 = arith.constant dense<0.000000e+00> : vector<17x128xf32>
    %169 = tpu.matmul %166, %168, %cst_59 {dimension_numbers = #tpu.dot_dimension_numbers<[1], [0], [0], [1], [0, 0, 1, 1], [], []>} : vector<17x256xbf16>, vector<256x128xbf16>, vector<17x128xf32> -> vector<17x128xf32>
    %170 = arith.addf %123, %169 : vector<17x128xf32>
    %c0_60 = arith.constant 0 : index
    %c0_61 = arith.constant 0 : index
    %c0_62 = arith.constant 0 : index
    %171 = vector.load %arg13[%c0_60, %c0_61, %c0_62] : memref<1x1x128xf32, #tpu.memory_space<vmem>>, vector<1x1x128xf32>
    %172 = vector.shape_cast %171 : vector<1x1x128xf32> to vector<1x128xf32>
    %173 = vector.broadcast %172 : vector<1x128xf32> to vector<17x128xf32>
    %174 = arith.addf %170, %173 : vector<17x128xf32>
    %c0_63 = arith.constant 0 : index
    %c0_64 = arith.constant 0 : index
    %175 = vector.load %arg15[%c0_63, %c0_64] : memref<17x128xf32, #tpu.memory_space<vmem>>, vector<17x128xf32>
    tpu.vector_store %arg15[%c0_63, %c0_64], %174 {strides = array<i32>} : memref<17x128xf32, #tpu.memory_space<vmem>>, vector<17x128xf32>,
    %c1_i32 = arith.constant 1 : i32
    %176 = arith.cmpi eq, %arg1, %c1_i32 : i32
    %177 = arith.extui %176 : i1 to i32
    %c0_i32_65 = arith.constant 0 : i32
    %178 = arith.cmpi ne, %177, %c0_i32_65 : i32
    scf.if %178 {
      %179 = vector.extract_strided_slice %174 {offsets = [1, 0], sizes = [16, 128], strides = [1, 1]} : vector<17x128xf32> to vector<16x128xf32>
      %c0_66 = arith.constant 0 : index
      %c0_67 = arith.constant 0 : index
      %c0_68 = arith.constant 0 : index
      %180 = vector.load %arg14[%c0_66, %c0_67, %c0_68] : memref<1x16x128xf32, #tpu.memory_space<vmem>>, vector<1x16x128xf32>
      %181 = vector.shape_cast %180 : vector<1x16x128xf32> to vector<16x128xf32>
      %182 = vector.shape_cast %179 : vector<16x128xf32> to vector<1x16x128xf32>
      tpu.vector_store %arg14[%c0_66, %c0_67, %c0_68], %182 {strides = array<i32>} : memref<1x16x128xf32, #tpu.memory_space<vmem>>, vector<1x16x128xf32>,
    } else {
    }
    return
  }
  func.func @transform_0(%arg0: i32, %arg1: i32) -> (i32, i32, i32) {
    %c0_i32 = arith.constant 0 : i32
    %c0_i32_0 = arith.constant 0 : i32
    %c0_i32_1 = arith.constant 0 : i32
    return %arg0, %c0_i32, %c0_i32_0 : i32, i32, i32
  }
  func.func @transform_1(%arg0: i32, %arg1: i32) -> (i32, i32) {
    %c0_i32 = arith.constant 0 : i32
    %c0_i32_0 = arith.constant 0 : i32
    %c0_i32_1 = arith.constant 0 : i32
    return %c0_i32, %c0_i32_0 : i32, i32
  }
  func.func @transform_2(%arg0: i32, %arg1: i32) -> (i32, i32, i32) {
    %c0_i32 = arith.constant 0 : i32
    %c0_i32_0 = arith.constant 0 : i32
    %c0_i32_1 = arith.constant 0 : i32
    return %arg1, %c0_i32, %c0_i32_0 : i32, i32, i32
  }
  func.func @transform_3(%arg0: i32, %arg1: i32) -> (i32, i32, i32) {
    %c0_i32 = arith.constant 0 : i32
    %c0_i32_0 = arith.constant 0 : i32
    %c0_i32_1 = arith.constant 0 : i32
    return %arg1, %c0_i32, %c0_i32_0 : i32, i32, i32
  }
  func.func @transform_4(%arg0: i32, %arg1: i32) -> (i32, i32, i32) {
    %c0_i32 = arith.constant 0 : i32
    %c0_i32_0 = arith.constant 0 : i32
    %c0_i32_1 = arith.constant 0 : i32
    return %arg1, %c0_i32, %c0_i32_0 : i32, i32, i32
  }
  func.func @transform_5(%arg0: i32, %arg1: i32) -> (i32, i32, i32) {
    %c0_i32 = arith.constant 0 : i32
    %c0_i32_0 = arith.constant 0 : i32
    %c0_i32_1 = arith.constant 0 : i32
    return %arg1, %c0_i32, %c0_i32_0 : i32, i32, i32
  }
  func.func @transform_6(%arg0: i32, %arg1: i32) -> (i32, i32, i32) {
    %c0_i32 = arith.constant 0 : i32
    %c0_i32_0 = arith.constant 0 : i32
    %c0_i32_1 = arith.constant 0 : i32
    return %arg1, %c0_i32, %c0_i32_0 : i32, i32, i32
  }
  func.func @transform_7(%arg0: i32, %arg1: i32) -> (i32, i32, i32) {
    %c0_i32 = arith.constant 0 : i32
    %c0_i32_0 = arith.constant 0 : i32
    %c0_i32_1 = arith.constant 0 : i32
    return %arg1, %c0_i32, %c0_i32_0 : i32, i32, i32
  }
  func.func @transform_8(%arg0: i32, %arg1: i32) -> (i32, i32, i32) {
    %c0_i32 = arith.constant 0 : i32
    %c0_i32_0 = arith.constant 0 : i32
    %c0_i32_1 = arith.constant 0 : i32
    return %arg1, %c0_i32, %c0_i32_0 : i32, i32, i32
  }
  func.func @transform_9(%arg0: i32, %arg1: i32) -> (i32, i32, i32) {
    %c0_i32 = arith.constant 0 : i32
    %c0_i32_0 = arith.constant 0 : i32
    %c0_i32_1 = arith.constant 0 : i32
    return %arg1, %c0_i32, %c0_i32_0 : i32, i32, i32
  }
  func.func @transform_10(%arg0: i32, %arg1: i32) -> (i32, i32, i32) {
    %c0_i32 = arith.constant 0 : i32
    %c0_i32_0 = arith.constant 0 : i32
    %c0_i32_1 = arith.constant 0 : i32
    return %arg1, %c0_i32, %c0_i32_0 : i32, i32, i32
  }
  func.func @transform_11(%arg0: i32, %arg1: i32) -> (i32, i32, i32) {
    %c0_i32 = arith.constant 0 : i32
    %c0_i32_0 = arith.constant 0 : i32
    %c0_i32_1 = arith.constant 0 : i32
    return %arg1, %c0_i32, %c0_i32_0 : i32, i32, i32
  }
  func.func @transform_12(%arg0: i32, %arg1: i32) -> (i32, i32, i32) {
    %c0_i32 = arith.constant 0 : i32
    %c0_i32_0 = arith.constant 0 : i32
    %c0_i32_1 = arith.constant 0 : i32
    return %arg0, %c0_i32, %c0_i32_0 : i32, i32, i32
  }
}

</mosaic_0001>

<bundles_post_ra>
// kernel: vision_tower_dynamic_s2_forward.2
= control target key start
LH: loop header
LB: loop body
LE: loop exit
PB: predicated region body
PF: predicated region fallthrough
CT: control target
= control target key end

     0   :  { %s1173_s1 = inlined_call_operand.vmem [shape: bf16[768,128], index: 1, kind: input, shape index: {}]   ;;  %s1174_s2 = inlined_call_operand.vmem [shape: f32[1,128], index: 2, kind: input, shape index: {}]   ;;  %s1175_s0 = inlined_call_operand.vmem [shape: bf16[32,768], index: 0, kind: input, shape index: {}]   ;;  %s1176_s3 = inlined_call_operand.vmem [shape: bf16[32,128], index: 3, kind: output, shape index: {}]  }
   0x1   :  { %v859_v0 = vld [vmem:[%s1173_s1 + $0x38] sm:$0xff]  ;;  %v858_v4 = vld [vmem:[%s1173_s1 + $0x30] sm:$0xff]  ;;  %v857_v8 = vld [vmem:[%s1173_s1 + $0x28] sm:$0xff] }
   0x2   :  { %v867_v1 = vld [vmem:[%s1173_s1 + $0x78] sm:$0xff]  ;;  %474 = vmatpush.bf16.msra.mxu0 %v859_v0  ;;  %v866_v5 = vld [vmem:[%s1173_s1 + $0x70] sm:$0xff]  ;;  %v865_v9 = vld [vmem:[%s1173_s1 + $0x68] sm:$0xff] }
   0x3   :  { %v875_v2 = vld [vmem:[%s1173_s1 + $0xb8] sm:$0xff]  ;;  %493 = vmatpush.bf16.msra.mxu1 %v867_v1  ;;  %v874_v6 = vld [vmem:[%s1173_s1 + $0xb0] sm:$0xff]  ;;  %v873_v10 = vld [vmem:[%s1173_s1 + $0xa8] sm:$0xff] }
   0x4   :  { %v883_v3 = vld [vmem:[%s1173_s1 + $0xf8] sm:$0xff]  ;;  %512 = vmatpush.bf16.msra.mxu2 %v875_v2  ;;  %v882_v7 = vld [vmem:[%s1173_s1 + $0xf0] sm:$0xff]  ;;  %v881_v11 = vld [vmem:[%s1173_s1 + $0xe8] sm:$0xff] }
   0x5   :  { %531 = vmatpush.bf16.msra.mxu3 %v883_v3  ;;  %v856_v12 = vld [vmem:[%s1173_s1 + $0x20] sm:$0xff]  ;;  %v855_v16 = vld [vmem:[%s1173_s1 + $0x18] sm:$0xff]  ;;  %v854_v20 = vld [vmem:[%s1173_s1 + $0x10] sm:$0xff] }
   0x6   :  { %475 = vmatpush.bf16.msra.mxu0 %v858_v4  ;;  %v864_v13 = vld [vmem:[%s1173_s1 + $0x60] sm:$0xff]  ;;  %v863_v17 = vld [vmem:[%s1173_s1 + $0x58] sm:$0xff]  ;;  %v862_v21 = vld [vmem:[%s1173_s1 + $0x50] sm:$0xff] }
   0x7   :  { %494 = vmatpush.bf16.msra.mxu1 %v866_v5  ;;  %v872_v14 = vld [vmem:[%s1173_s1 + $0xa0] sm:$0xff]  ;;  %v871_v18 = vld [vmem:[%s1173_s1 + $0x98] sm:$0xff]  ;;  %v870_v22 = vld [vmem:[%s1173_s1 + $0x90] sm:$0xff] }
   0x8   :  { %513 = vmatpush.bf16.msra.mxu2 %v874_v6  ;;  %v880_v15 = vld [vmem:[%s1173_s1 + $0xe0] sm:$0xff]  ;;  %v879_v19 = vld [vmem:[%s1173_s1 + $0xd8] sm:$0xff]  ;;  %v878_v23 = vld [vmem:[%s1173_s1 + $0xd0] sm:$0xff] }
   0x9   :  { %532 = vmatpush.bf16.msra.mxu3 %v882_v7  ;;  %v853_v24 = vld [vmem:[%s1173_s1 + $0x8] sm:$0xff]  ;;  %v852_v28 = vld [vmem:[%s1173_s1] sm:$0xff]  ;;  %v843_v33 = vld [vmem:[%s1175_s0 + $0x14] sm:$0xf0] }
   0xa   :  { %476 = vmatpush.bf16.msra.mxu0 %v857_v8  ;;  %v861_v25 = vld [vmem:[%s1173_s1 + $0x48] sm:$0xff]  ;;  %v860_v29 = vld [vmem:[%s1173_s1 + $0x40] sm:$0xff]  ;;  %v604_v35 = vld [vmem:[%s1175_s0 + $0x18] sm:$0xf0] }
   0xb   :  { %495 = vmatpush.bf16.msra.mxu1 %v865_v9  ;;  %v869_v26 = vld [vmem:[%s1173_s1 + $0x88] sm:$0xff]  ;;  %v868_v30 = vld [vmem:[%s1173_s1 + $0x80] sm:$0xff]  ;;  %v891_v40 = vld [vmem:[%s1173_s1 + $0x138] sm:$0xff] }
   0xc   :  { %514 = vmatpush.bf16.msra.mxu2 %v873_v10  ;;  %v877_v27 = vld [vmem:[%s1173_s1 + $0xc8] sm:$0xff]  ;;  %v876_v31 = vld [vmem:[%s1173_s1 + $0xc0] sm:$0xff]  ;;  %v899_v45 = vld [vmem:[%s1173_s1 + $0x178] sm:$0xff] }
   0xd   :  { %533 = vmatpush.bf16.msra.mxu3 %v881_v11  ;;  %v602_v32 = vld [vmem:[%s1175_s0] sm:$0xf]  ;;  %v840_v34 = vld [vmem:[%s1175_s0 + $0x4] sm:$0xf]  ;;  %v610_v36 = vld [vmem:[%s1175_s0 + $0x8] sm:$0xf] }
   0xe   :  { %477 = vmatpush.bf16.msra.mxu0 %v856_v12  ;;  %v844_v37 = vld [vmem:[%s1175_s0 + $0x1c] sm:$0xf0]  ;;  %v841_v38 = vld [vmem:[%s1175_s0 + $0xc] sm:$0xf]  ;;  %v612_v39 = vld [vmem:[%s1175_s0 + $0x20] sm:$0xf0]  ;;  %v603_v41 = vor.u32 %v843_v33, %v602_v32  ;;  %v607_v42 = vor.u32 %v840_v34, %v604_v35 }
   0xf   :  { %496 = vmatpush.bf16.msra.mxu1 %v864_v13  ;;  %v611_v43 = vor.u32 %v844_v37, %v610_v36  ;;  %v615_v44 = vor.u32 %v841_v38, %v612_v39  ;;  %v890_v46 = vld [vmem:[%s1173_s1 + $0x130] sm:$0xff]  ;;  %v889_v48 = vld [vmem:[%s1173_s1 + $0x128] sm:$0xff]  ;;  %v888_v50 = vld [vmem:[%s1173_s1 + $0x120] sm:$0xff] }
  0x10   :  { %515 = vmatpush.bf16.msra.mxu2 %v872_v14  ;;  %v898_v47 = vld [vmem:[%s1173_s1 + $0x170] sm:$0xff]  ;;  %v897_v49 = vld [vmem:[%s1173_s1 + $0x168] sm:$0xff]  ;;  %v896_v51 = vld [vmem:[%s1173_s1 + $0x160] sm:$0xff] }
  0x11   :  { %534 = vmatpush.bf16.msra.mxu3 %v880_v15  ;;  %v626_v52 = vld [vmem:[%s1175_s0 + $0x30] sm:$0xf]  ;;  %v849_v53 = vld [vmem:[%s1175_s0 + $0x44] sm:$0xf0]  ;;  %v846_v54 = vld [vmem:[%s1175_s0 + $0x34] sm:$0xf] }
  0x12   :  { %478 = vmatpush.bf16.msra.mxu0 %v855_v16  ;;  %v628_v55 = vld [vmem:[%s1175_s0 + $0x48] sm:$0xf0]  ;;  %v634_v56 = vld [vmem:[%s1175_s0 + $0x38] sm:$0xf]  ;;  %v850_v57 = vld [vmem:[%s1175_s0 + $0x4c] sm:$0xf0]  ;;  %v627_v61 = vor.u32 %v849_v53, %v626_v52 }
  0x13   :  { %497 = vmatpush.bf16.msra.mxu1 %v863_v17  ;;  %v847_v58 = vld [vmem:[%s1175_s0 + $0x3c] sm:$0xf]  ;;  %v636_v59 = vld [vmem:[%s1175_s0 + $0x50] sm:$0xf0]  ;;  %v631_v62 = vor.u32 %v846_v54, %v628_v55  ;;  %v635_v63 = vor.u32 %v850_v57, %v634_v56  ;;  %v885_v4 = vld [vmem:[%s1173_s1 + $0x108] sm:$0xff] }
  0x14   :  { %516 = vmatpush.bf16.msra.mxu2 %v871_v18  ;;  %v887_v60 = vld [vmem:[%s1173_s1 + $0x118] sm:$0xff]  ;;  %v639_v0 = vor.u32 %v847_v58, %v636_v59  ;;  %v886_v2 = vld [vmem:[%s1173_s1 + $0x110] sm:$0xff]  ;;  %v893_v5 = vld [vmem:[%s1173_s1 + $0x148] sm:$0xff] }
  0x15   :  { %535 = vmatpush.bf16.msra.mxu3 %v879_v19  ;;  %v895_v1 = vld [vmem:[%s1173_s1 + $0x158] sm:$0xff]  ;;  %v894_v3 = vld [vmem:[%s1173_s1 + $0x150] sm:$0xff]  ;;  %v884_v6 = vld [vmem:[%s1173_s1 + $0x100] sm:$0xff] }
  0x16   :  { %479 = vmatpush.bf16.msra.mxu0 %v854_v20  ;;  %v892_v7 = vld [vmem:[%s1173_s1 + $0x140] sm:$0xff]  ;;  %v618_v8 = vld [vmem:[%s1175_s0 + $0x10] sm:$0xf]  ;;  %v845_v9 = vld [vmem:[%s1175_s0 + $0x24] sm:$0xf0] }
  0x17   :  { %498 = vmatpush.bf16.msra.mxu1 %v862_v21  ;;  %v642_v10 = vld [vmem:[%s1175_s0 + $0x40] sm:$0xf]  ;;  %v851_v11 = vld [vmem:[%s1175_s0 + $0x54] sm:$0xf0]  ;;  %v842_v12 = vld [vmem:[%s1175_s0 + $0x14] sm:$0xf]  ;;  %v619_v16 = vor.u32 %v845_v9, %v618_v8 }
  0x18   :  { %517 = vmatpush.bf16.msra.mxu2 %v870_v22  ;;  %v620_v13 = vld [vmem:[%s1175_s0 + $0x28] sm:$0xf0]  ;;  %v848_v14 = vld [vmem:[%s1175_s0 + $0x44] sm:$0xf]  ;;  %v644_v15 = vld [vmem:[%s1175_s0 + $0x58] sm:$0xf0]  ;;  %v643_v17 = vor.u32 %v851_v11, %v642_v10 }
  0x19   :  { %536 = vmatpush.bf16.msra.mxu3 %v878_v23  ;;  %v623_v18 = vor.u32 %v842_v12, %v620_v13  ;;  %v647_v19 = vor.u32 %v848_v14, %v644_v15 }
  0x1a   :  { %480 = vmatpush.bf16.msra.mxu0 %v853_v24 }
  0x1b   :  { %499 = vmatpush.bf16.msra.mxu1 %v861_v25 }
  0x1c   :  { %518 = vmatpush.bf16.msra.mxu2 %v869_v26 }
  0x1d   :  { %537 = vmatpush.bf16.msra.mxu3 %v877_v27 }
  0x1e   :  { %481 = vmatpush.bf16.msra.mxu0 %v852_v28 }
  0x1f   :  { %500 = vmatpush.bf16.msra.mxu1 %v860_v29 }
  0x20   :  { %519 = vmatpush.bf16.msra.mxu2 %v868_v30  ;;  %v927_v30 = vld [vmem:[%s1174_s2] ss:$0 sm:$0xff] }
  0x21   :  { %538 = vmatpush.bf16.msra.mxu3 %v876_v31  ;;  %482 = vmatmul.bf16.vlgmr.msra.gmra.mxu0 %v603_v41 }
  0x22   :  { %550 = vmatpush.bf16.msrb.mxu0 %v891_v40  ;;  %501 = vmatmul.bf16.vlgmr.msra.gmra.mxu1 %v607_v42 }
  0x23   :  { %520 = vmatmul.bf16.vlgmr.msra.gmra.mxu2 %v611_v43  ;;  %569 = vmatpush.bf16.msrb.mxu1 %v899_v45 }
  0x24   :  { %911 = vmatpush.bf16.msrb.mxu2 %v891_v40  ;;  %539 = vmatmul.bf16.vlgmr.msra.gmra.mxu3 %v615_v44 }
  0x25   :  { %919 = vmatpush.bf16.msrb.mxu3 %v899_v45 }
  0x26   :  { %551 = vmatpush.bf16.msrb.mxu0 %v890_v46 }
  0x27   :  { %570 = vmatpush.bf16.msrb.mxu1 %v898_v47 }
  0x28   :  { %912 = vmatpush.bf16.msrb.mxu2 %v890_v46 }
  0x29   :  { %920 = vmatpush.bf16.msrb.mxu3 %v898_v47 }
  0x2a   :  { %552 = vmatpush.bf16.msrb.mxu0 %v889_v48 }
  0x2b   :  { %571 = vmatpush.bf16.msrb.mxu1 %v897_v49 }
  0x2c   :  { %913 = vmatpush.bf16.msrb.mxu2 %v889_v48 }
  0x2d   :  { %921 = vmatpush.bf16.msrb.mxu3 %v897_v49 }
  0x2e   :  { %553 = vmatpush.bf16.msrb.mxu0 %v888_v50 }
  0x2f   :  { %572 = vmatpush.bf16.msrb.mxu1 %v896_v51 }
  0x30   :  { %914 = vmatpush.bf16.msrb.mxu2 %v888_v50 }
  0x31   :  { %922 = vmatpush.bf16.msrb.mxu3 %v896_v51  ;;  %487 = vmatmul.bf16.gmra.mxu0 %v627_v61 }
  0x32   :  { %554 = vmatpush.bf16.msrb.mxu0 %v887_v60  ;;  %506 = vmatmul.bf16.gmra.mxu1 %v631_v62 }
  0x33   :  { %525 = vmatmul.bf16.gmra.mxu2 %v635_v63  ;;  %573 = vmatpush.bf16.msrb.mxu1 %v895_v1 }
  0x34   :  { %915 = vmatpush.bf16.msrb.mxu2 %v887_v60  ;;  %544 = vmatmul.bf16.gmra.mxu3 %v639_v0 }
  0x35   :  { %923 = vmatpush.bf16.msrb.mxu3 %v895_v1 }
  0x36   :  { %555 = vmatpush.bf16.msrb.mxu0 %v886_v2 }
  0x37   :  { %574 = vmatpush.bf16.msrb.mxu1 %v894_v3 }
  0x38   :  { %916 = vmatpush.bf16.msrb.mxu2 %v886_v2 }
  0x39   :  { %924 = vmatpush.bf16.msrb.mxu3 %v894_v3 }
  0x3a   :  { %556 = vmatpush.bf16.msrb.mxu0 %v885_v4 }
  0x3b   :  { %575 = vmatpush.bf16.msrb.mxu1 %v893_v5 }
  0x3c   :  { %917 = vmatpush.bf16.msrb.mxu2 %v885_v4 }
  0x3d   :  { %925 = vmatpush.bf16.msrb.mxu3 %v893_v5 }
  0x3e   :  { %557 = vmatpush.bf16.msrb.mxu0 %v884_v6 }
  0x3f   :  { %576 = vmatpush.bf16.msrb.mxu1 %v892_v7 }
  0x40   :  { %918 = vmatpush.bf16.msrb.mxu2 %v884_v6 }
  0x41   :  { %926 = vmatpush.bf16.msrb.mxu3 %v892_v7  ;;  %558 = vmatmul.bf16.vlgmr.msrb.gmra.mxu0 %v619_v16 }
  0x42   :  { %577 = vmatmul.bf16.vlgmr.msrb.gmra.mxu1 %v623_v18 }
  0x43   :  { %563 = vmatmul.bf16.vlgmr.msrb.gmra.mxu2 %v643_v17 }
  0x44   :  { %582 = vmatmul.bf16.vlgmr.msrb.gmra.mxu3 %v647_v19 }
  0x9e   :  { %v483_v20 = vpop.f32.mrf.mxu0 }
  0x9f   :  { %v502_v21 = vpop.f32.mrf.mxu1  ;;  %v484_v35 = vadd.f32 %v927_v30, %v483_v20 }
  0xa1   :  { %v503_v36 = vadd.f32 %v502_v21, %v484_v35 }
  0xa6   :  { %v521_v22 = vpop.f32.mrf.mxu2  ;;  %v485_v24 = vpop.f32.mrf.mxu0 }
  0xa7   :  { %v540_v23 = vpop.f32.mrf.mxu3  ;;  %v504_v25 = vpop.f32.mrf.mxu1  ;;  %v486_v37 = vadd.f32 %v927_v30, %v485_v24  ;;  %v522_v42 = vadd.f32 %v521_v22, %v503_v36 }
  0xa9   :  { %v505_v43 = vadd.f32 %v504_v25, %v486_v37  ;;  %v541_v48 = vadd.f32 %v540_v23, %v522_v42 }
  0xae   :  { %v523_v26 = vpop.f32.mrf.mxu2  ;;  %v488_v28 = vpop.f32.mrf.mxu0 }
  0xaf   :  { %v542_v27 = vpop.f32.mrf.mxu3  ;;  %v507_v29 = vpop.f32.mrf.mxu1  ;;  %v489_v40 = vadd.f32 %v927_v30, %v488_v28  ;;  %v524_v45 = vadd.f32 %v523_v26, %v505_v43 }
  0xb1   :  { %v508_v46 = vadd.f32 %v507_v29, %v489_v40  ;;  %v543_v49 = vadd.f32 %v542_v27, %v524_v45 }
  0xb6   :  { %v526_v31 = vpop.f32.mrf.mxu2  ;;  %v490_v33 = vpop.f32.mrf.mxu0 }
  0xb7   :  { %v545_v32 = vpop.f32.mrf.mxu3  ;;  %v509_v34 = vpop.f32.mrf.mxu1  ;;  %v491_v47 = vadd.f32 %v927_v30, %v490_v33  ;;  %v527_v52 = vadd.f32 %v526_v31, %v508_v46 }
  0xb9   :  { %v510_v53 = vadd.f32 %v509_v34, %v491_v47  ;;  %v546_v61 = vadd.f32 %v545_v32, %v527_v52 }
  0xbe   :  { %v528_v38 = vpop.f32.mrf.mxu2  ;;  %v559_v41 = vpop.f32.mrf.mxu0 }
  0xbf   :  { %v547_v39 = vpop.f32.mrf.mxu3  ;;  %v578_v44 = vpop.f32.mrf.mxu1  ;;  %v560_v50 = vadd.f32 %v559_v41, %v541_v48  ;;  %v529_v57 = vadd.f32 %v528_v38, %v510_v53 }
  0xc1   :  { %v579_v59 = vadd.f32 %v578_v44, %v560_v50  ;;  %v548_v63 = vadd.f32 %v547_v39, %v529_v57 }
  0xc6   :  { %v564_v51 = vpop.f32.mrf.mxu2  ;;  %v561_v55 = vpop.f32.mrf.mxu0 }
  0xc7   :  { %v583_v54 = vpop.f32.mrf.mxu3  ;;  %v562_v56 = vadd.f32 %v561_v55, %v543_v49  ;;  %v580_v58 = vpop.f32.mrf.mxu1  ;;  %v565_v0 = vadd.f32 %v564_v51, %v546_v61 }
  0xc9   :  { %v581_v60 = vadd.f32 %v580_v58, %v562_v56  ;;  %v584_v4 = vadd.f32 %v583_v54, %v565_v0 }
  0xcb   :  { %v903_v62 = vpack.c.bf16 %v581_v60, %v579_v59 }
  0xcd   :  { %904 = vst [vmem:[%s1176_s3] sm:$0xff] %v903_v62  }
  0xce   :  { %v566_v1 = vpop.f32.mrf.mxu2 }
  0xcf   :  { %v567_v2 = vadd.f32 %v566_v1, %v548_v63  ;;  %v585_v3 = vpop.f32.mrf.mxu3 }
  0xd1   :  { %v586_v5 = vadd.f32 %v585_v3, %v567_v2 }
  0xd3   :  { %v908_v6 = vpack.c.bf16 %v586_v5, %v584_v4 }
  0xd5   :  { %910 = vst [vmem:[%s1176_s3 + $0x8] sm:$0xff] %v908_v6  }

// kernel: vision_tower_dynamic_s2_forward.3
= control target key start
LH: loop header
LB: loop body
LE: loop exit
PB: predicated region body
PF: predicated region fallthrough
CT: control target
= control target key end

     0   :  { %s3638_s0 = inlined_call_operand.vmem [shape: f32[2,17,128], index: 0, kind: input, shape index: {}]   ;;  %s3639_s1 = inlined_call_operand.vmem [shape: f32[2,128], index: 1, kind: input, shape index: {}]   ;;  %s3640_s2 = inlined_call_operand.vmem [shape: f32[2,2,128], index: 2, kind: input, shape index: {}]   ;;  %s3641_s3 = inlined_call_operand.vmem [shape: bf16[2,128,384], index: 3, kind: input, shape index: {}]   ;;  %s3642_s4 = inlined_call_operand.vmem [shape: f32[2,1,384], index: 4, kind: input, shape index: {}]   ;;  %s3643_s5 = inlined_call_operand.vmem [shape: bf16[2,128,128], index: 5, kind: input, shape index: {}]   ;;  %s3644_s6 = inlined_call_operand.vmem [shape: f32[2,1,128], index: 6, kind: input, shape index: {}]   ;;  %s3645_s7 = inlined_call_operand.vmem [shape: f32[2,2,128], index: 7, kind: input, shape index: {}]   ;;  %s3646_s8 = inlined_call_operand.vmem [shape: bf16[2,128,256], index: 8, kind: input, shape index: {}]   ;;  %s3647_s9 = inlined_call_operand.vmem [shape: f32[2,1,256], index: 9, kind: input, shape index: {}]   ;;  %s3648_s10 = inlined_call_operand.vmem [shape: bf16[2,256,128], index: 10, kind: input, shape index: {}]   ;;  %s3649_s11 = inlined_call_operand.vmem [shape: f32[2,1,128], index: 11, kind: input, shape index: {}]   ;;  %s3650_s12 = inlined_call_operand.hbm [shape: f32[2,16,128], index: 12, kind: output, shape index: {}]  }
   0x1   :  { %3666 = sst [smem:[#allocation19_spill]] %s3638_s0 }
   0x2   :  { %3667 = sst [smem:[#allocation20_spill]] %s3639_s1 }
   0x3   :  { %3668 = sst [smem:[#allocation21_spill]] %s3641_s3 }
   0x4   :  { %3669 = sst [smem:[#allocation22_spill]] %s3649_s11 }
   0x5   :  { %3670 = sst [smem:[#allocation23_spill]] %s3650_s12 }
   0x6   :  { %17 = vsyncpa [#allocation4], 0 }
   0x7   :  { %19 = vsyncpa [#allocation4 + $0x1], 0  ;;  %s3021_s21 = smov 0   ;;  %s3023_s22 = smov 0  }
   0x8   :  { %s3025_s23 = smov 0   ;;  %s3027_s24 = smov 0  }
   0x9   :  { %s3029_s25 = smov 0   ;;  %s3031_s26 = smov 0  }
   0xa   :  { %s3033_s27 = smov 0   ;;  %s3035_s28 = smov 0  }
   0xb LB: > { %3671 = sst [smem:[#allocation6_spill]] %s2918_s21  ;;  %s2286_s29 = sadd.s32 4294967295, %s2946_s28   ;;  %s2946_s28 = sphi %s3035_s28, %s25_s28   ;;  %s2942_s27 = sphi %s3033_s27, %s3716_s27   ;;  %s2938_s26 = sphi %s3031_s26, %s3715_s26   ;;  %s2934_s25 = sphi %s3029_s25, %s3714_s25   ;;  %s2930_s24 = sphi %s3027_s24, %s3713_s24   ;;  %s2926_s23 = sphi %s3025_s23, %s3712_s23   ;;  %s2922_s22 = sphi %s3023_s22, %s3711_s22   ;;  %s2918_s21 = sphi %s3021_s21, %s3710_s21  }
   0xc   : > { %3672 = sst [smem:[#allocation7_spill]] %s2922_s22  ;;  %s2287_s30 = sadd.s32 4294967294, %s2946_s28  }
   0xd   : > { %3673 = sst [smem:[#allocation8_spill]] %s2926_s23  ;;  %s34_s13 = sadd.s32 1, %s2938_s26 }
   0xe   : > { %3674 = sst [smem:[#allocation9_spill]] %s2930_s24  ;;  %p35_p0 = scmp.ge.s32.totalorder %s34_s13, 2 }
   0xf   : > { %3675 = sst [smem:[#allocation10_spill]] %s2934_s25  ;;  %s37_s14 = sadd.s32 1, %s2942_s27 }
  0x10   : > { %3676 = sst [smem:[#allocation11_spill]] %s2938_s26  ;;  %p361_p1 = scmp.ne.s32.totalorder %s2926_s23, %s2922_s22 }
  0x11   : > { %3677 = sst [smem:[#allocation12_spill]] %s2942_s27  ;;  %p362_p2 = scmp.eq.s32.totalorder %s2286_s29, 3 }
  0x12   : > { %3678 = sst [smem:[#allocation13_spill]] %s2946_s28  ;;  %s3718_s13 = smov (%p35_p0, %s34_s13), 0 }
  0x13   : > { %3679 = sst [smem:[#allocation14_spill]] %s3718_s13  ;;  %s3720_s14 = smov (!%p35_p0, %s37_s14), %s2942_s27 }
  0x14   : > { %p3070_p3 = por %p362_p2, %p361_p1  ;;  %p367_p4 = scmp.ne.s32.totalorder %s2922_s22, %s2918_s21 }
  0x15   : > { %p39_p5 = scmp.ge.s32.totalorder %s3720_s14, 2  ;;  %p368_p6 = scmp.eq.s32.totalorder %s2287_s30, 3 }
  0x16   : > { %s3680_s15 = scalar_select %p3070_p3, 1, 0 }
  0x17   : > { %p2290_p7 = scmp.ge.s32.totalorder %s2946_s28, 1  ;;  %p469_p8 = scmp.lt.s32.totalorder %s2946_s28, 5 }
  0x18   : > { %3681 = sst [smem:[#allocation15_spill]] %s3680_s15  ;;  %s3722_s14 = smov (%p39_p5, %s3720_s14), 0 }
  0x19   : > { %3682 = sst [smem:[#allocation16_spill]] %s3722_s14  ;;  %p3080_p9 = por %p368_p6, %p367_p4 }
  0x1a   : > { %p470_p10 = pnand %p2290_p7, %p469_p8  ;;  %s348_s17 = ssub.s32 %s2942_s27, %s3722_s14 }
  0x1b   : > { %s3683_s16 = scalar_select %p3080_p9, 1, 0 }
  0x1c   : > { %s351_s18 = sadd.s32 1, %s2926_s23  ;;  %p349_p11 = scmp.eq.s32.totalorder %s348_s17, 0 }
  0x1d   : > { %3684 = sst [smem:[#allocation17_spill]] %s3683_s16  ;;  %473 = sbr.rel (%p470_p10) target bundleno = 2398 (0x95e), region = 68 }
  0x1e   : > { %s3088_s19 = scalar_select %p349_p11, %s2926_s23, %s351_s18  }
  0x1f   : > { %s3653_s20 = sand.u32 (!%p470_p10), 1, %s2922_s22   ;;  %p553_p12 = scmp.lt.s32.totalorder (!%p470_p10), %s2934_s25, 1 }
  0x20   : > { %3685 = sst [smem:[#allocation18_spill]] %s3088_s19  ;;  %s2291_s29 = sshll.u32 (!%p470_p10), %s3653_s20, 4 }
  0x21   : > { %p558_p13 = scmp.lt.s32.totalorder (!%p470_p10), %s2930_s24, 1  ;;  %s3686_s0 = sld [smem:[#allocation19_spill]] (!%p470_p10) }
  0x22   : > { %s554_s30 = scalar_select %p553_p12, %s2934_s25, 1 }
  0x23   : > { %s3097_s13 = scalar_select %p558_p13, %s2930_s24, 1 }
  0x24   : > { %s2656_s17 = smul.u32 24, %s554_s30  ;;  %s3687_s3 = sld [smem:[#allocation21_spill]] }
  0x25   : > { %s3100_s18 = sshll.u32 %s3097_s13, 1  ;;  %s2657_s14 = smul.u32 192, %s3097_s13 }
  0x26   : > { %s2658_s30 = smul.u32 3, %s3097_s13  ;;  %s2588_s15 = sshll.u32 %s3097_s13, 6 }
  0x27   : > { %s557_s26 = scalar_lea.vmem %s3686_s0, %s2656_s17  ;;  %s3129_s23 = scalar_lea.vmem %s3643_s5, %s2588_s15 }
  0x28   : > { %s3124_s27 = scalar_lea.vmem %s3642_s4, %s2658_s30  ;;  %s591_s11 = scalar_lea.vmem %s3647_s9, %s3100_s18 }
  0x29   : > { %s3154_s21 = scalar_lea.vmem [#allocation3], %s2291_s29  ;;  %s3689_s28 = sld [smem:[#allocation9_spill]] }
  0x2a   : > { %s3113_s12 = scalar_lea.vmem %s3687_s3, %s2657_s14  ;;  %s2589_s14 = sshll.u32 %s3097_s13, 7 }
  0x2b   : > { %s3139_s22 = scalar_lea.vmem %s3646_s8, %s2589_s14  ;;  %s3148_s20 = scalar_lea.vmem %s3648_s10, %s2589_s14 }
  0x2c   : > { %s3688_s3 = sld [smem:[#allocation22_spill]] }
  0x2f   : > { %p2303_p0 = scmp.ne.s32.totalorder %s3689_s28, 0 }
  0x31   : > { %604 = sbr.rel (%p2303_p0) target bundleno = 331 (0x14b), region = 72 }
  0x32   : > { %s599_s19 = scalar_lea.vmem %s3688_s3, %s3097_s13  ;;  %s3690_s3 = sld [smem:[#allocation20_spill]] (!%p2303_p0) }
  0x36   : > { %v606_v0 = vld [vmem:[%s557_s26 + $0x8] sm:$0xff]  ;;  %v607_v1 = vld [vmem:[%s557_s26 + $0x10] sm:$0x1]  ;;  %vm613_vm0 = vcmask 1040384   ;;  %v605_v3 = vld [vmem:[%s557_s26] sm:$0xff]  ;;  %v2948_v4 = vmov 128.0  }
  0x37   : > { %611 = vadd.xlane.f32.xlu1 %v606_v0  ;;  %v614_v2 = vsel %vm613_vm0, %v607_v1, 0.0  ;;  %2738 = vrcp.f32 %v2948_v4 }
  0x38   : > { %615 = vadd.xlane.f32.xlu0 %v614_v2  ;;  %v608_v37 = vld [vmem:[%s3690_s3] sm:$0x3] }
  0x39   : > { %v679_v43 = vperm.slane %v608_v37, 0  ;;  %v683_v47 = vperm.slane %v608_v37, 1 }
  0x3d   : > { %v2739_v5 = vpop.eup %2738 }
  0x3e   : > { %v618_v6 = vmul.f32 128.0, %v2739_v5  ;;  %vm622_vm1 = vweird.f32 %v2739_v5 }
  0x40   : > { %609 = vadd.xlane.f32.xlu0 %v605_v3  ;;  %v619_v7 = vsub.f32 1.0, %v618_v6 }
  0x42   : > { %v620_v8 = vmul.f32 %v2739_v5, %v619_v7 }
  0x44   : > { %v621_v9 = vadd.f32 %v2739_v5, %v620_v8 }
  0x46   : > { %v623_v10 = vsel %vm622_vm1, %v2739_v5, %v621_v9 }
  0xaa   : > { %v612_v11 = vpop.xlane.xlu1 %611 }
  0xab   : > { %v625_v12 = vmul.f32 %v623_v10, %v612_v11  ;;  %v616_v13 = vpop.xlane.xlu0 %615 }
  0xac   : > { %v626_v14 = vmul.f32 %v623_v10, %v616_v13 }
  0xad   : > { %v628_v15 = vsub.f32 %v606_v0, %v625_v12 }
  0xae   : > { %v629_v17 = vsub.f32 %v607_v1, %v626_v14 }
  0xaf   : > { %v631_v16 = vmul.f32 %v628_v15, %v628_v15 }
  0xb0   : > { %v632_v20 = vmul.f32 %v629_v17, %v629_v17 }
  0xb1   : > { %635 = vadd.xlane.f32.xlu2 %v631_v16 }
  0xb2   : > { %v637_v22 = vsel %vm613_vm0, %v632_v20, 0.0 }
  0xb3   : > { %v610_v18 = vpop.xlane.xlu0 %609 }
  0xb4   : > { %v624_v19 = vmul.f32 %v623_v10, %v610_v18 }
  0xb6   : > { %v627_v21 = vsub.f32 %v605_v3, %v624_v19 }
  0xb8   : > { %v630_v23 = vmul.f32 %v627_v21, %v627_v21 }
  0xb9   : > { %638 = vadd.xlane.f32.xlu2 %v637_v22 }
  0xba   : > { %633 = vadd.xlane.f32.xlu1 %v630_v23 }
 0x124   : > { %v636_v24 = vpop.xlane.xlu2 %635 }
 0x125   : > { %v641_v25 = vmul.f32 %v636_v24, %v623_v10 }
 0x127   : > { %v644_v26 = vadd.f32 1e-05, %v641_v25 }
 0x129   : > { %2740 = vrsqrt.f32 %v644_v26  ;;  %vm662_vm3 = vweird.f32 %v644_v26 }
 0x12c   : > { %v639_v27 = vpop.xlane.xlu2 %638 }
 0x12d   : > { %v642_v28 = vmul.f32 %v639_v27, %v623_v10  ;;  %v634_v29 = vpop.xlane.xlu1 %633 }
 0x12e   : > { %v640_v30 = vmul.f32 %v634_v29, %v623_v10 }
 0x12f   : > { %v2741_v31 = vpop.eup %2740  ;;  %v645_v32 = vadd.f32 1e-05, %v642_v28 }
 0x130   : > { %v657_v33 = vmul.f32 %v2741_v31, %v644_v26  ;;  %v643_v34 = vadd.f32 1e-05, %v640_v30  ;;  %vm663_vm2 = vweird.f32 %v2741_v31 }
 0x131   : > { %2742 = vrsqrt.f32 %v645_v32  ;;  %vm664_vm4 = vmor %vm662_vm3, %vm663_vm2  ;;  %vm672_vm7 = vweird.f32 %v645_v32 }
 0x132   : > { %v658_v35 = vmul.f32 %v2741_v31, %v657_v33  ;;  %2744 = vrsqrt.f32 %v643_v34  ;;  %vm652_vm9 = vweird.f32 %v643_v34 }
 0x134   : > { %v659_v36 = vmul.f32 0.5, %v658_v35 }
 0x136   : > { %v660_v38 = vsub.f32 1.5, %v659_v36 }
 0x137   : > { %v2743_v39 = vpop.eup %2742 }
 0x138   : > { %v2745_v40 = vpop.eup %2744  ;;  %v661_v41 = vmul.f32 %v2741_v31, %v660_v38  ;;  %v667_v42 = vmul.f32 %v2743_v39, %v645_v32  ;;  %vm673_vm5 = vweird.f32 %v2743_v39 }
 0x139   : > { %v647_v44 = vmul.f32 %v2745_v40, %v643_v34  ;;  %vm653_vm6 = vweird.f32 %v2745_v40  ;;  %vm674_vm8 = vmor %vm672_vm7, %vm673_vm5 }
 0x13a   : > { %v665_v45 = vsel %vm664_vm4, %v2741_v31, %v661_v41  ;;  %v668_v46 = vmul.f32 %v2743_v39, %v667_v42  ;;  %vm654_vm10 = vmor %vm652_vm9, %vm653_vm6 }
 0x13b   : > { %v677_v48 = vmul.f32 %v665_v45, %v628_v15  ;;  %v648_v49 = vmul.f32 %v2745_v40, %v647_v44 }
 0x13c   : > { %v669_v50 = vmul.f32 0.5, %v668_v46 }
 0x13d   : > { %v681_v51 = vmul.f32 %v679_v43, %v677_v48  ;;  %v649_v52 = vmul.f32 0.5, %v648_v49 }
 0x13e   : > { %v670_v53 = vsub.f32 1.5, %v669_v50 }
 0x13f   : > { %v685_v54 = vadd.f32 %v683_v47, %v681_v51  ;;  %v650_v55 = vsub.f32 1.5, %v649_v52 }
 0x140   : > { %v671_v56 = vmul.f32 %v2743_v39, %v670_v53 }
 0x141   : > { %688 = vst [vmem:[#allocation2] sm:$0xff] %v685_v54  ;;  %v651_v57 = vmul.f32 %v2745_v40, %v650_v55 }
 0x142   : > { %v675_v58 = vsel %vm674_vm8, %v2743_v39, %v671_v56 }
 0x143   : > { %v678_v59 = vmul.f32 %v675_v58, %v629_v17  ;;  %v655_v60 = vsel %vm654_vm10, %v2745_v40, %v651_v57 }
 0x144   : > { %v676_v61 = vmul.f32 %v655_v60, %v627_v21 }
 0x145   : > { %v682_v62 = vmul.f32 %v679_v43, %v678_v59 }
 0x146   : > { %v680_v63 = vmul.f32 %v679_v43, %v676_v61 }
 0x147   : > { %v686_v0 = vadd.f32 %v683_v47, %v682_v62 }
 0x148   : > { %v684_v1 = vadd.f32 %v683_v47, %v680_v63 }
 0x149   : > { %689 = vst [vmem:[#allocation2 + $0x8] sm:$0x1] %v686_v0 }
 0x14a   : > { %687 = vst [vmem:[#allocation2 + $0x10] sm:$0xff] %v684_v1 }
 0x14b PF: > { %vm698_vm11 = vcmask 1040384   ;;  %v691_v5 = vld [vmem:[#allocation2] sm:$0xff]  ;;  %v2949_v6 = vmov 128.0   ;;  %v2390_v26 = vld [vmem:[%s3113_s12 + $0xa8] sm:$0xf]  ;;  %s3691_s16 = scalar_lea.vmem %s3640_s2, %s3100_s18  ;;  %s2950_s29 = smov 96  }
 0x14c   : > { %2763 = vrcp.f32 %v2949_v6  ;;  %v2613_v27 = vld [vmem:[%s3113_s12 + $0xb0] sm:$0xf0]  ;;  %v2612_v28 = vld [vmem:[%s3113_s12 + $0xac] sm:$0xf]  ;;  %v2392_v30 = vld [vmem:[%s3113_s12 + $0xb4] sm:$0xf0]  ;;  %s3692_s25 = scalar_lea.vmem %s3644_s6, %s3097_s13  ;;  %s3693_s30 = scalar_lea.vmem %s3645_s7, %s3100_s18 }
 0x14d   : > { %v2391_v29 = vor.u32 %v2613_v27, %v2390_v26  ;;  %v2398_v31 = vld [vmem:[%s3113_s12 + $0xb0] sm:$0xf]  ;;  %v2614_v32 = vld [vmem:[%s3113_s12 + $0xb8] sm:$0xf0]  ;;  %v2395_v33 = vor.u32 %v2612_v28, %v2392_v30  ;;  %v2609_v37 = vld [vmem:[%s3113_s12 + $0x94] sm:$0xf] }
 0x14e   : > { %v2399_v34 = vor.u32 %v2614_v32, %v2398_v31  ;;  %v2378_v35 = vld [vmem:[%s3113_s12 + $0x90] sm:$0xf]  ;;  %v2610_v36 = vld [vmem:[%s3113_s12 + $0x98] sm:$0xf0]  ;;  %v2380_v39 = vld [vmem:[%s3113_s12 + $0x9c] sm:$0xf0] }
 0x14f   : > { %942 = vmatpush.bf16.msra.mxu0 %v2391_v29  ;;  %960 = vmatpush.bf16.msra.mxu1 %v2395_v33  ;;  %v2379_v38 = vor.u32 %v2610_v36, %v2378_v35  ;;  %v2386_v40 = vld [vmem:[%s3113_s12 + $0x98] sm:$0xf]  ;;  %v2611_v41 = vld [vmem:[%s3113_s12 + $0xa0] sm:$0xf0]  ;;  %v2383_v42 = vor.u32 %v2609_v37, %v2380_v39  ;;  %v2606_v46 = vld [vmem:[%s3113_s12 + $0x7c] sm:$0xf] }
 0x150   : > { %v692_v3 = vld [vmem:[#allocation2 + $0x8] sm:$0x1]  ;;  %978 = vmatpush.bf16.msra.mxu2 %v2399_v34  ;;  %v2387_v43 = vor.u32 %v2611_v41, %v2386_v40  ;;  %v2366_v44 = vld [vmem:[%s3113_s12 + $0x78] sm:$0xf]  ;;  %v2607_v45 = vld [vmem:[%s3113_s12 + $0x80] sm:$0xf0] }
 0x151   : > { %v690_v2 = vld [vmem:[#allocation2 + $0x10] sm:$0xff]  ;;  %v699_v4 = vsel %vm698_vm11, %v692_v3, 0.0  ;;  %v2367_v47 = vor.u32 %v2607_v45, %v2366_v44  ;;  %v2368_v48 = vld [vmem:[%s3113_s12 + $0x84] sm:$0xf0]  ;;  %v2374_v49 = vld [vmem:[%s3113_s12 + $0x80] sm:$0xf] }
 0x152   : > { %694 = vadd.xlane.f32.xlu0 %v690_v2  ;;  %700 = vadd.xlane.f32.xlu1 %v699_v4  ;;  %v2764_v7 = vpop.eup %2763  ;;  %v2608_v50 = vld [vmem:[%s3113_s12 + $0x88] sm:$0xf0]  ;;  %v2371_v51 = vor.u32 %v2606_v46, %v2368_v48  ;;  %v2354_v53 = vld [vmem:[%s3113_s12 + $0x60] sm:$0xf]  ;;  %v2603_v55 = vld [vmem:[%s3113_s12 + $0x64] sm:$0xf] }
 0x153   : > { %v703_v8 = vmul.f32 128.0, %v2764_v7  ;;  %vm707_vm12 = vweird.f32 %v2764_v7  ;;  %943 = vmatpush.bf16.msra.mxu0 %v2379_v38  ;;  %961 = vmatpush.bf16.msra.mxu1 %v2383_v42  ;;  %v2375_v52 = vor.u32 %v2608_v50, %v2374_v49  ;;  %v2604_v54 = vld [vmem:[%s3113_s12 + $0x68] sm:$0xf0]  ;;  %v2356_v57 = vld [vmem:[%s3113_s12 + $0x6c] sm:$0xf0]  ;;  %vm1002_vm6 = vcmask 261120  }
 0x154   : > { %979 = vmatpush.bf16.msra.mxu2 %v2387_v43  ;;  %v2355_v56 = vor.u32 %v2604_v54, %v2354_v53  ;;  %v2362_v58 = vld [vmem:[%s3113_s12 + $0x68] sm:$0xf]  ;;  %v2605_v59 = vld [vmem:[%s3113_s12 + $0x70] sm:$0xf0]  ;;  %v2359_v60 = vor.u32 %v2603_v55, %v2356_v57  ;;  %v2600_v0 = vld [vmem:[%s3113_s12 + $0x4c] sm:$0xf] }
 0x155   : > { %v704_v9 = vsub.f32 1.0, %v703_v8  ;;  %v2363_v61 = vor.u32 %v2605_v59, %v2362_v58  ;;  %v2342_v62 = vld [vmem:[%s3113_s12 + $0x48] sm:$0xf]  ;;  %v2601_v63 = vld [vmem:[%s3113_s12 + $0x50] sm:$0xf0]  ;;  %s2953_s28 = smov 32  }
 0x156   : > { %v2343_v1 = vor.u32 %v2601_v63, %v2342_v62  ;;  %v2602_v4 = vld [vmem:[%s3113_s12 + $0x58] sm:$0xf0]  ;;  %v2596_v26 = vld [vmem:[%s3113_s12 + $0x28] sm:$0xf0]  ;;  %v2306_v31 = vld [vmem:[%s3113_s12] sm:$0xf] }
 0x157   : > { %v705_v10 = vmul.f32 %v2764_v7, %v704_v9  ;;  %944 = vmatpush.bf16.msra.mxu0 %v2367_v47  ;;  %962 = vmatpush.bf16.msra.mxu1 %v2371_v51  ;;  %v2598_v8 = vld [vmem:[%s3113_s12 + $0x38] sm:$0xf0]  ;;  %v2597_v9 = vld [vmem:[%s3113_s12 + $0x34] sm:$0xf]  ;;  %v2592_v32 = vld [vmem:[%s3113_s12 + $0x8] sm:$0xf0] }
 0x158   : > { %980 = vmatpush.bf16.msra.mxu2 %v2375_v52  ;;  %v2591_v33 = vld [vmem:[%s3113_s12 + $0x4] sm:$0xf]  ;;  %v2307_v34 = vor.u32 %v2592_v32, %v2306_v31  ;;  %v2308_v35 = vld [vmem:[%s3113_s12 + $0xc] sm:$0xf0]  ;;  %v2314_v36 = vld [vmem:[%s3113_s12 + $0x8] sm:$0xf] }
 0x159   : > { %v706_v11 = vadd.f32 %v2764_v7, %v705_v10  ;;  %v2593_v37 = vld [vmem:[%s3113_s12 + $0x10] sm:$0xf0]  ;;  %v2311_v39 = vor.u32 %v2591_v33, %v2308_v35  ;;  %v693_v58 = vld [vmem:[%s3691_s16] sm:$0x3]  ;;  %vm1033_vm7 = vcmask 138240   ;;  %vm1040_vm8 = vcmask 131072  }
 0x15a   : > { %696 = vadd.xlane.f32.xlu0 %v691_v5  ;;  %v2315_v40 = vor.u32 %v2593_v37, %v2314_v36  ;;  %v764_v62 = vperm.slane %v693_v58, 0  ;;  %vm1459_vm9 = vcmask 523264   ;;  %vm1463_vm10 = vcmask 785408   ;;  %s3701_s13 = sld [smem:[#allocation9_spill]] }
 0x15b   : > { %v3163_v12 = vsel %vm707_vm12, %v2764_v7, %v706_v11  ;;  %945 = vmatpush.bf16.msra.mxu0 %v2355_v56  ;;  %963 = vmatpush.bf16.msra.mxu1 %v2359_v60  ;;  %v2330_v7 = vld [vmem:[%s3113_s12 + $0x30] sm:$0xf]  ;;  %v2332_v11 = vld [vmem:[%s3113_s12 + $0x3c] sm:$0xf0] }
 0x15c   : > { %981 = vmatpush.bf16.msra.mxu2 %v2363_v61  ;;  %v2331_v10 = vor.u32 %v2598_v8, %v2330_v7 }
 0x15f   : > { %946 = vmatpush.bf16.msra.mxu0 %v2343_v1 }
 0x160   : > { %p2582_p1 = scmp.ne.s32.totalorder %s3701_s13, 1 }
 0x163   : > { %947 = vmatpush.bf16.msra.mxu0 %v2331_v10 }
 0x1c5   : > { %v695_v13 = vpop.xlane.xlu0 %694  ;;  %v701_v17 = vpop.xlane.xlu1 %700 }
 0x1c6   : > { %v709_v14 = vmul.f32 %v3163_v12, %v695_v13  ;;  %v711_v19 = vmul.f32 %v3163_v12, %v701_v17  ;;  %v2338_v13 = vld [vmem:[%s3113_s12 + $0x38] sm:$0xf] }
 0x1c8   : > { %v3166_v15 = vsub.f32 %v690_v2, %v709_v14  ;;  %v3174_v22 = vsub.f32 %v692_v3, %v711_v19  ;;  %v2344_v2 = vld [vmem:[%s3113_s12 + $0x54] sm:$0xf0]  ;;  %v2350_v3 = vld [vmem:[%s3113_s12 + $0x50] sm:$0xf]  ;;  %v2599_v14 = vld [vmem:[%s3113_s12 + $0x40] sm:$0xf0] }
 0x1c9   : > { %v2351_v6 = vor.u32 %v2602_v4, %v2350_v3  ;;  %v2339_v17 = vor.u32 %v2599_v14, %v2338_v13  ;;  %v2595_v19 = vld [vmem:[%s3113_s12 + $0x20] sm:$0xf0] }
 0x1ca   : > { %v715_v16 = vmul.f32 %v3166_v15, %v3166_v15  ;;  %v717_v24 = vmul.f32 %v3174_v22, %v3174_v22 }
 0x1cb   : > { %982 = vmatpush.bf16.msra.mxu2 %v2351_v6 }
 0x1cc   : > { %718 = vadd.xlane.f32.xlu1 %v715_v16  ;;  %v722_v25 = vsel %vm698_vm11, %v717_v24, 0.0  ;;  %v2335_v16 = vor.u32 %v2597_v9, %v2332_v11  ;;  %v2320_v24 = vld [vmem:[%s3113_s12 + $0x24] sm:$0xf0] }
 0x1cd   : > { %v697_v18 = vpop.xlane.xlu0 %696 }
 0x1ce   : > { %v710_v20 = vmul.f32 %v3163_v12, %v697_v18  ;;  %v2318_v18 = vld [vmem:[%s3113_s12 + $0x18] sm:$0xf] }
 0x1cf   : > { %983 = vmatpush.bf16.msra.mxu2 %v2339_v17 }
 0x1d0   : > { %v3172_v21 = vsub.f32 %v691_v5, %v710_v20  ;;  %v2347_v5 = vor.u32 %v2600_v0, %v2344_v2  ;;  %v2594_v20 = vld [vmem:[%s3113_s12 + $0x1c] sm:$0xf] }
 0x1d1   : > { %v2323_v27 = vor.u32 %v2594_v20, %v2320_v24  ;;  %v806_v20 = vld [vmem:[%s3124_s27] sm:$0x7]  ;;  %s2951_s27 = smov 64  }
 0x1d2   : > { %v716_v23 = vmul.f32 %v3172_v21, %v3172_v21  ;;  %964 = vmatpush.bf16.msra.mxu1 %v2347_v5  ;;  %v768_v5 = vperm.slane %v693_v58, 1  ;;  %v809_v24 = vperm.slane %v806_v20, 1 }
 0x1d4   : > { %720 = vadd.xlane.f32.xlu2 %v716_v23  ;;  %v2319_v23 = vor.u32 %v2595_v19, %v2318_v18 }
 0x1d6   : > { %965 = vmatpush.bf16.msra.mxu1 %v2335_v16  ;;  %948 = vmatpush.bf16.msra.mxu0 %v2319_v23  ;;  %v808_v23 = vperm.slane %v806_v20, 0 }
 0x1da   : > { %966 = vmatpush.bf16.msra.mxu1 %v2323_v27  ;;  %949 = vmatpush.bf16.msra.mxu0 %v2307_v34 }
 0x1dc   : > { %723 = vadd.xlane.f32.xlu2 %v722_v25  ;;  %v2326_v25 = vld [vmem:[%s3113_s12 + $0x20] sm:$0xf] }
 0x1dd   : > { %v2327_v28 = vor.u32 %v2596_v26, %v2326_v25 }
 0x1de   : > { %967 = vmatpush.bf16.msra.mxu1 %v2311_v39 }
 0x1df   : > { %984 = vmatpush.bf16.msra.mxu2 %v2327_v28 }
 0x1e3   : > { %985 = vmatpush.bf16.msra.mxu2 %v2315_v40 }
 0x23f   : > { %v719_v29 = vpop.xlane.xlu1 %718 }
 0x240   : > { %v725_v30 = vmul.f32 %v719_v29, %v3163_v12 }
 0x242   : > { %v728_v38 = vadd.f32 1e-05, %v725_v30 }
 0x244   : > { %2765 = vrsqrt.f32 %v728_v38  ;;  %vm737_vm14 = vweird.f32 %v728_v38 }
 0x247   : > { %v721_v41 = vpop.xlane.xlu2 %720 }
 0x248   : > { %v726_v42 = vmul.f32 %v721_v41, %v3163_v12  ;;  %v810_v41 = vperm.slane %v806_v20, 2 }
 0x24a   : > { %v2766_v43 = vpop.eup %2765  ;;  %v729_v44 = vadd.f32 1e-05, %v726_v42 }
 0x24b   : > { %v732_v45 = vmul.f32 %v2766_v43, %v728_v38  ;;  %vm738_vm13 = vweird.f32 %v2766_v43 }
 0x24c   : > { %2767 = vrsqrt.f32 %v729_v44  ;;  %vm739_vm15 = vmor %vm737_vm14, %vm738_vm13  ;;  %vm747_vm1 = vweird.f32 %v729_v44 }
 0x24d   : > { %v733_v46 = vmul.f32 %v2766_v43, %v732_v45 }
 0x24f   : > { %v734_v47 = vmul.f32 0.5, %v733_v46  ;;  %v724_v48 = vpop.xlane.xlu2 %723 }
 0x250   : > { %v727_v49 = vmul.f32 %v724_v48, %v3163_v12 }
 0x251   : > { %v735_v50 = vsub.f32 1.5, %v734_v47  ;;  %v2952_v47 = vmov 0  }
 0x252   : > { %v2768_v51 = vpop.eup %2767  ;;  %v730_v52 = vadd.f32 1e-05, %v727_v49  ;;  %v3250_v48 = vsel %vm698_vm11, 65535, %v2952_v47 }
 0x253   : > { %v736_v53 = vmul.f32 %v2766_v43, %v735_v50  ;;  %v742_v54 = vmul.f32 %v2768_v51, %v729_v44  ;;  %vm748_vm0 = vweird.f32 %v2768_v51 }
 0x254   : > { %2769 = vrsqrt.f32 %v730_v52  ;;  %vm749_vm2 = vmor %vm747_vm1, %vm748_vm0  ;;  %vm757_vm3 = vweird.f32 %v730_v52 }
 0x255   : > { %v743_v55 = vmul.f32 %v2768_v51, %v742_v54  ;;  %v740_v56 = vsel %vm739_vm15, %v2766_v43, %v736_v53 }
 0x256   : > { %v761_v61 = vmul.f32 %v740_v56, %v3166_v15 }
 0x257   : > { %v744_v57 = vmul.f32 0.5, %v743_v55 }
 0x258   : > { %v765_v4 = vmul.f32 %v764_v62, %v761_v61 }
 0x259   : > { %v745_v59 = vsub.f32 1.5, %v744_v57 }
 0x25a   : > { %v2770_v60 = vpop.eup %2769  ;;  %v769_v9 = vadd.f32 %v768_v5, %v765_v4 }
 0x25b   : > { %v746_v63 = vmul.f32 %v2768_v51, %v745_v59  ;;  %v752_v0 = vmul.f32 %v2770_v60, %v730_v52  ;;  %vm758_vm4 = vweird.f32 %v2770_v60 }
 0x25c   : > { %vm759_vm5 = vmor %vm757_vm3, %vm758_vm4 }
 0x25d   : > { %v750_v1 = vsel %vm749_vm2, %v2768_v51, %v746_v63  ;;  %v753_v2 = vmul.f32 %v2770_v60, %v752_v0 }
 0x25e   : > { %v762_v3 = vmul.f32 %v750_v1, %v3172_v21 }
 0x25f   : > { %v754_v6 = vmul.f32 0.5, %v753_v2 }
 0x260   : > { %v766_v7 = vmul.f32 %v764_v62, %v762_v3 }
 0x261   : > { %v755_v8 = vsub.f32 1.5, %v754_v6 }
 0x262   : > { %v770_v10 = vadd.f32 %v768_v5, %v766_v7 }
 0x263   : > { %v756_v11 = vmul.f32 %v2770_v60, %v755_v8 }
 0x264   : > { %v772_v15 = vpack.c.bf16 %v770_v10, %v769_v9 }
 0x265   : > { %v760_v13 = vsel %vm759_vm5, %v2770_v60, %v756_v11 }
 0x266   : > { %950 = vmatmul.bf16.vlgmr.msra.gmra.mxu0 %v772_v15  ;;  %968 = vmatmul.bf16.vlgmr.msra.gmra.mxu1 %v772_v15  ;;  %v763_v14 = vmul.f32 %v760_v13, %v3174_v22 }
 0x267   : > { %986 = vmatmul.bf16.vlgmr.msra.gmra.mxu2 %v772_v15 }
 0x268   : > { %v767_v21 = vmul.f32 %v764_v62, %v763_v14 }
 0x26a   : > { %v771_v16 = vadd.f32 %v768_v5, %v767_v21 }
 0x26c   : > { %v773_v17 = vpack.c.bf16 %v771_v16, %v771_v16 }
 0x276   : > { %955 = vmatmul.bf16.gmra.mxu0 %v773_v17  ;;  %973 = vmatmul.bf16.gmra.mxu1 %v773_v17 }
 0x277   : > { %991 = vmatmul.bf16.gmra.mxu2 %v773_v17 }
 0x2e3   : > { %v951_v18 = vpop.f32.mrf.mxu0  ;;  %v969_v19 = vpop.f32.mrf.mxu1 }
 0x2e4   : > { %v952_v28 = vadd.f32 %v951_v18, %v808_v23  ;;  %v970_v29 = vadd.f32 %v969_v19, %v809_v24 }
 0x2ea   : > { %v987_v25 = vpop.f32.mrf.mxu2 }
 0x2eb   : > { %v953_v26 = vpop.f32.mrf.mxu0  ;;  %v971_v27 = vpop.f32.mrf.mxu1  ;;  %v988_v52 = vadd.f32 %v987_v25, %v810_v41 }
 0x2ec   : > { %v954_v30 = vadd.f32 %v953_v26, %v808_v23  ;;  %v972_v31 = vadd.f32 %v971_v27, %v809_v24 }
 0x2ee   : > { %v996_v32 = vpack.c.bf16 %v954_v30, %v952_v28  ;;  %v998_v22 = vpack.c.bf16 %v972_v31, %v970_v29 }
 0x2f0   : > { %1107 = vrot.lane.b32.xlu1 %v998_v22, %s2950_s29  ;;  %1101 = vrot.lane.b32.xlu2 %v996_v32, %s2950_s29  ;;  %v1010_v50 = vsel %vm1002_vm6, %v998_v22, 0 }
 0x2f2   : > { %v989_v33 = vpop.f32.mrf.mxu2 }
 0x2f3   : > { %v956_v34 = vpop.f32.mrf.mxu0  ;;  %v974_v35 = vpop.f32.mrf.mxu1  ;;  %v990_v49 = vadd.f32 %v989_v33, %v810_v41 }
 0x2f4   : > { %v957_v36 = vadd.f32 %v956_v34, %v808_v23  ;;  %v975_v37 = vadd.f32 %v974_v35, %v809_v24 }
 0x2f5   : > { %v3258_v54 = vpack.c.bf16 %v990_v49, %v988_v52 }
 0x2f6   : > { %v997_v38 = vpack.c.bf16 %v957_v36, %v957_v36  ;;  %v999_v39 = vpack.c.bf16 %v975_v37, %v975_v37 }
 0x2f8   : > { %1214 = vrot.lane.b32.xlu2 %v998_v22, %s2951_s27  ;;  %1109 = vrot.lane.b32.xlu0 %v999_v39, %s2950_s29  ;;  %v1013_v40 = vsel %vm1002_vm6, %v999_v39, 0 }
 0x2f9   : > { %1103 = vrot.lane.b32.xlu1 %v997_v38, %s2950_s29  ;;  %1021 = vmatpush.bf16.xpose.msra.mxu3 %v1013_v40 }
 0x2fa   : > { %v992_v42 = vpop.f32.mrf.mxu2 }
 0x2fb   : > { %v993_v43 = vadd.f32 %v992_v42, %v810_v41  ;;  %v958_v44 = vpop.f32.mrf.mxu0  ;;  %v976_v45 = vpop.f32.mrf.mxu1 }
 0x2fd   : > { %v3247_v46 = vpack.c.bf16 %v993_v43, %v993_v43 }
 0x2ff   : > { %v1079_v51 = vand.u32 %v3250_v48, %v3247_v46 }
 0x300   : > { %1210 = vrot.lane.b32.xlu2 %v996_v32, %s2951_s27  ;;  %1216 = vrot.lane.b32.xlu0 %v999_v39, %s2951_s27 }
 0x301   : > { %1319 = vrot.lane.b32.xlu1 %v998_v22, %s2953_s28  ;;  %1022 = vmatpush.bf16.xpose.msra.mxu3 %v1010_v50 }
 0x302   : > { %v994_v53 = vpop.f32.mrf.mxu2 }
 0x308   : > { %1321 = vrot.lane.b32.xlu0 %v999_v39, %s2953_s28  ;;  %2400 = vmatmul.msk.bf16.vlgmr.msra.gmra.mxu3 %vm1002_vm6, %v996_v32 }
 0x309   : > { %1087 = vmatpush.bf16.msrb.mxu3 %v1079_v51  ;;  %1212 = vrot.lane.b32.xlu2 %v997_v38, %s2951_s27 }
 0x30a   : > { %1317 = vrot.lane.b32.xlu1 %v997_v38, %s2953_s28 }
 0x30d   : > { %1088 = vmatpush.bf16.msrb.mxu3 %v3258_v54 }
 0x310   : > { %1315 = vrot.lane.b32.xlu0 %v996_v32, %s2953_s28 }
 0x318   : > { %2401 = vmatmul.msk.bf16.gmra.mxu3 %vm1002_vm6, %v997_v38 }
 0x34a   : > { %v1102_v58 = vpop.permute.xlu2 %1101 }
 0x352   : > { %v1215_v63 = vpop.permute.xlu2 %1214 }
 0x353   : > { %v1225_v2 = vsel %vm1002_vm6, %v1215_v63, 0 }
 0x35a   : > { %v1211_v4 = vpop.permute.xlu2 %1210 }
 0x362   : > { %v1108_v57 = vpop.permute.xlu1 %1107 }
 0x363   : > { %v1118_v60 = vsel %vm1002_vm6, %v1108_v57, 0  ;;  %v1213_v8 = vpop.permute.xlu2 %1212 }
 0x36a   : > { %v1110_v55 = vpop.permute.xlu0 %1109 }
 0x36b   : > { %v1121_v56 = vsel %vm1002_vm6, %v1110_v55, 0  ;;  %v1104_v62 = vpop.permute.xlu1 %1103 }
 0x36c   : > { %1129 = vmatpush.bf16.xpose.msrb.mxu0 %v1121_v56 }
 0x372   : > { %v1217_v59 = vpop.permute.xlu0 %1216 }
 0x373   : > { %v1228_v61 = vsel %vm1002_vm6, %v1217_v59, 0  ;;  %v1320_v3 = vpop.permute.xlu1 %1319 }
 0x374   : > { %1130 = vmatpush.bf16.xpose.msrb.mxu0 %v1118_v60  ;;  %1236 = vmatpush.bf16.xpose.msrb.mxu2 %v1228_v61  ;;  %v1330_v5 = vsel %vm1002_vm6, %v1320_v3, 0 }
 0x37a   : > { %v1322_v0 = vpop.permute.xlu0 %1321 }
 0x37b   : > { %v1333_v1 = vsel %vm1002_vm6, %v1322_v0, 0  ;;  %2404 = vmatmul.msk.bf16.vlgmr.msrb.gmra.mxu0 %vm1002_vm6, %v1102_v58 }
 0x37c   : > { %1237 = vmatpush.bf16.xpose.msrb.mxu2 %v1225_v2  ;;  %1341 = vmatpush.bf16.xpose.msra.mxu0 %v1333_v1  ;;  %v1318_v21 = vpop.permute.xlu1 %1317 }
 0x382   : > { %v1316_v11 = vpop.permute.xlu0 %1315 }
 0x383   : > { %2408 = vmatmul.msk.bf16.vlgmr.msrb.gmra.mxu2 %vm1002_vm6, %v1211_v4 }
 0x384   : > { %1342 = vmatpush.bf16.xpose.msra.mxu0 %v1330_v5 }
 0x38b   : > { %v1024_v6 = vpop.f32.mrf.mxu3  ;;  %2405 = vmatmul.msk.bf16.gmra.mxu0 %vm1002_vm6, %v1104_v62 }
 0x38c   : > { %v1034_v7 = vsel %vm1033_vm7, %v1024_v6, -inf }
 0x38d   : > { %1035 = vmax.xlane.f32.xlu0 %v1034_v7 }
 0x393   : > { %v1026_v9 = vpop.f32.mrf.mxu3  ;;  %2409 = vmatmul.msk.bf16.gmra.mxu2 %vm1002_vm6, %v1213_v8 }
 0x394   : > { %v1037_v10 = vsel %vm1033_vm7, %v1026_v9, -inf }
 0x395   : > { %1038 = vmax.xlane.f32.xlu2 %v1037_v10 }
 0x39b   : > { %v1029_v15 = vpop.f32.mrf.mxu3  ;;  %2412 = vmatmul.msk.bf16.vlgmr.msra.gmra.mxu0 %vm1002_vm6, %v1316_v11 }
 0x39c   : > { %v1041_v13 = vsel %vm1040_vm8, %v1029_v15, -inf }
 0x39d   : > { %1042 = vmax.xlane.f32.xlu2 %v1041_v13 }
 0x3a3   : > { %v1031_v14 = vpop.f32.mrf.mxu3 }
 0x3ab   : > { %2413 = vmatmul.msk.bf16.gmra.mxu0 %vm1002_vm6, %v1318_v21 }
 0x3b5   : > { %1178 = vrot.lane.b32.xlu2 %v3258_v54, %s2950_s29 }
 0x3f8   : > { %v1132_v16 = vpop.f32.mrf.mxu0 }
 0x3f9   : > { %v1141_v17 = vsel %vm1033_vm7, %v1132_v16, -inf }
 0x3fa   : > { %1142 = vmax.xlane.f32.xlu1 %v1141_v17 }
 0x400   : > { %v3285_v18 = vpop.f32.mrf.mxu0  ;;  %v1036_v19 = vpop.xlane.xlu0 %1035 }
 0x401   : > { %v1044_v20 = vsub.f32 %v1024_v6, %v1036_v19  ;;  %v1144_v29 = vsel %vm1033_vm7, %v3285_v18, -inf }
 0x403   : > { %v1047_v27 = vmul.f32 1.442695, %v1044_v20 }
 0x405   : > { %2771 = vpow2.f32 %v1047_v27 }
 0x406   : > { %v1239_v23 = vpop.f32.mrf.mxu2 }
 0x407   : > { %v1248_v24 = vsel %vm1033_vm7, %v1239_v23, -inf }
 0x408   : > { %v3288_v25 = vpop.f32.mrf.mxu0  ;;  %1249 = vmax.xlane.f32.xlu0 %v1248_v24  ;;  %v1039_v26 = vpop.xlane.xlu2 %1038 }
 0x409   : > { %v1045_v47 = vsub.f32 %v1026_v9, %v1039_v26  ;;  %v1147_v50 = vsel %vm1040_vm8, %v3288_v25, -inf }
 0x40b   : > { %v3298_v34 = vpop.eup %2771  ;;  %v1049_v49 = vmul.f32 1.442695, %v1045_v47 }
 0x40c   : > { %v1053_v36 = vsel %vm1033_vm7, %v3298_v34, 0.0 }
 0x40e   : > { %v3290_v28 = vpop.f32.mrf.mxu2 }
 0x40f   : > { %v1251_v30 = vsel %vm1033_vm7, %v3290_v28, -inf }
 0x410   : > { %v1139_v31 = vpop.f32.mrf.mxu0  ;;  %1145 = vmax.xlane.f32.xlu0 %v1144_v29  ;;  %1252 = vmax.xlane.f32.xlu2 %v1251_v30  ;;  %v1043_v32 = vpop.xlane.xlu2 %1042 }
 0x411   : > { %v1046_v22 = vsub.f32 %v1029_v15, %v1043_v32 }
 0x413   : > { %v1051_v33 = vmul.f32 1.442695, %v1046_v22  ;;  %1180 = vrot.lane.b32.xlu1 %v3247_v46, %s2950_s29 }
 0x415   : > { %2773 = vpow2.f32 %v1051_v33 }
 0x416   : > { %v3300_v35 = vpop.f32.mrf.mxu2  ;;  %2775 = vpow2.f32 %v1049_v49 }
 0x417   : > { %v1254_v37 = vsel %vm1040_vm8, %v3300_v35, -inf }
 0x418   : > { %v3306_v38 = vpop.f32.mrf.mxu0  ;;  %1054 = vadd.xlane.f32.xlu2 %v1053_v36  ;;  %1255 = vmax.xlane.f32.xlu0 %v1254_v37  ;;  %v1179_v61 = vpop.permute.xlu2 %1178 }
 0x419   : > { %v1353_v53 = vsel %vm1033_vm7, %v3306_v38, -inf }
 0x41b   : > { %v3308_v39 = vpop.eup %2773 }
 0x41c   : > { %v1059_v41 = vsel %vm1040_vm8, %v3308_v39, 0.0  ;;  %v3317_v51 = vpop.eup %2775 }
 0x41d   : > { %v1056_v52 = vsel %vm1033_vm7, %v3317_v51, 0.0 }
 0x41e   : > { %v1246_v40 = vpop.f32.mrf.mxu2 }
 0x420   : > { %v1346_v42 = vpop.f32.mrf.mxu0  ;;  %1060 = vadd.xlane.f32.xlu0 %v1059_v41 }
 0x421   : > { %v1356_v43 = vsel %vm1033_vm7, %v1346_v42, -inf }
 0x428   : > { %v3313_v44 = vpop.f32.mrf.mxu0  ;;  %1357 = vmax.xlane.f32.xlu0 %v1356_v43 }
 0x429   : > { %v1359_v55 = vsel %vm1040_vm8, %v3313_v44, -inf }
 0x430   : > { %v1351_v45 = vpop.f32.mrf.mxu0 }
 0x43d   : > { %1148 = vmax.xlane.f32.xlu1 %v1147_v50 }
 0x445   : > { %1057 = vadd.xlane.f32.xlu1 %v1056_v52 }
 0x44d   : > { %1354 = vmax.xlane.f32.xlu1 %v1353_v53 }
 0x455   : > { %1360 = vmax.xlane.f32.xlu1 %v1359_v55 }
 0x46d   : > { %v1143_v56 = vpop.xlane.xlu1 %1142 }
 0x46e   : > { %v1150_v57 = vsub.f32 %v1132_v16, %v1143_v56 }
 0x470   : > { %v1153_v58 = vmul.f32 1.442695, %v1150_v57 }
 0x472   : > { %2777 = vpow2.f32 %v1153_v58 }
 0x478   : > { %v3325_v59 = vpop.eup %2777 }
 0x479   : > { %v1159_v60 = vsel %vm1033_vm7, %v3325_v59, 0.0 }
 0x47a   : > { %1160 = vadd.xlane.f32.xlu0 %v1159_v60 }
 0x47b   : > { %v1250_v62 = vpop.xlane.xlu0 %1249 }
 0x47c   : > { %v1257_v63 = vsub.f32 %v1239_v23, %v1250_v62 }
 0x47e   : > { %v1260_v0 = vmul.f32 1.442695, %v1257_v63 }
 0x480   : > { %2779 = vpow2.f32 %v1260_v0 }
 0x483   : > { %v1146_v1 = vpop.xlane.xlu0 %1145  ;;  %v1253_v2 = vpop.xlane.xlu2 %1252 }
 0x484   : > { %v1151_v3 = vsub.f32 %v3285_v18, %v1146_v1  ;;  %v1258_v7 = vsub.f32 %v3290_v28, %v1253_v2 }
 0x485   : > { %v1181_v4 = vpop.permute.xlu1 %1180 }
 0x486   : > { %v3330_v5 = vpop.eup %2779  ;;  %v1155_v6 = vmul.f32 1.442695, %v1151_v3  ;;  %v1190_v8 = vand.u32 %v1181_v4, %v3250_v48  ;;  %v1262_v10 = vmul.f32 1.442695, %v1258_v7 }
 0x487   : > { %v1266_v9 = vsel %vm1033_vm7, %v3330_v5, 0.0 }
 0x488   : > { %2781 = vpow2.f32 %v1155_v6  ;;  %1198 = vmatpush.bf16.msrb.mxu1 %v1190_v8  ;;  %1267 = vadd.xlane.f32.xlu0 %v1266_v9 }
 0x489   : > { %2783 = vpow2.f32 %v1262_v10 }
 0x48b   : > { %v1256_v11 = vpop.xlane.xlu0 %1255  ;;  %v1055_v28 = vpop.xlane.xlu2 %1054 }
 0x48c   : > { %1199 = vmatpush.bf16.msrb.mxu1 %v1179_v61  ;;  %v1259_v50 = vsub.f32 %v3300_v35, %v1256_v11 }
 0x48e   : > { %v3336_v15 = vpop.eup %2781 }
 0x48f   : > { %v1162_v13 = vsel %vm1033_vm7, %v3336_v15, 0.0  ;;  %v3340_v21 = vpop.eup %2783 }
 0x490   : > { %1163 = vadd.xlane.f32.xlu2 %v1162_v13  ;;  %v1269_v16 = vsel %vm1033_vm7, %v3340_v21, 0.0 }
 0x493   : > { %v1061_v14 = vpop.xlane.xlu0 %1060 }
 0x498   : > { %1270 = vadd.xlane.f32.xlu2 %v1269_v16 }
 0x49b   : > { %v1358_v17 = vpop.xlane.xlu0 %1357 }
 0x49c   : > { %v1363_v18 = vsub.f32 %v1346_v42, %v1358_v17 }
 0x49e   : > { %v1367_v19 = vmul.f32 1.442695, %v1363_v18 }
 0x4a0   : > { %2785 = vpow2.f32 %v1367_v19 }
 0x4a6   : > { %v3344_v20 = vpop.eup %2785 }
 0x4a7   : > { %v1374_v23 = vsel %vm1033_vm7, %v3344_v20, 0.0 }
 0x4a8   : > { %1375 = vadd.xlane.f32.xlu1 %v1374_v23 }
 0x4b0   : > { %v1149_v24 = vpop.xlane.xlu1 %1148  ;;  %1283 = vrot.lane.b32.xlu2 %v3258_v54, %s2951_s27 }
 0x4b1   : > { %v1152_v26 = vsub.f32 %v3288_v25, %v1149_v24 }
 0x4b3   : > { %v1157_v27 = vmul.f32 1.442695, %v1152_v26 }
 0x4b5   : > { %2787 = vpow2.f32 %v1157_v27 }
 0x4b6   : > { %2789 = vrcp.f32 %v1055_v28 }
 0x4b8   : > { %v1058_v29 = vpop.xlane.xlu1 %1057  ;;  %1388 = vrot.lane.b32.xlu2 %v3258_v54, %s2953_s28 }
 0x4b9   : > { %2791 = vrcp.f32 %v1058_v29 }
 0x4ba   : > { %2793 = vrcp.f32 %v1061_v14 }
 0x4bb   : > { %v2788_v30 = vpop.eup %2787 }
 0x4bc   : > { %v1165_v31 = vsel %vm1040_vm8, %v2788_v30, 0.0  ;;  %v2790_v32 = vpop.eup %2789 }
 0x4bd   : > { %1166 = vadd.xlane.f32.xlu0 %v1165_v31  ;;  %v1065_v33 = vmul.f32 %v2790_v32, %v3298_v34 }
 0x4bf   : > { %v2792_v22 = vpop.eup %2791 }
 0x4c0   : > { %v1066_v36 = vmul.f32 %v2792_v22, %v3317_v51  ;;  %v2794_v37 = vpop.eup %2793  ;;  %v1355_v54 = vpop.xlane.xlu1 %1354 }
 0x4c1   : > { %1390 = vrot.lane.b32.xlu1 %v3247_v46, %s2953_s28  ;;  %v1067_v40 = vmul.f32 %v2794_v37, %v3308_v39  ;;  %v1362_v47 = vsub.f32 %v3306_v38, %v1355_v54 }
 0x4c2   : > { %v1068_v25 = vpack.c.bf16 %v1066_v36, %v1065_v33 }
 0x4c3   : > { %v1069_v41 = vpack.c.bf16 %v1067_v40, %v1067_v40  ;;  %v1365_v39 = vmul.f32 1.442695, %v1362_v47  ;;  %v2620_v47 = vld [vmem:[%s3129_s23 + $0x28] sm:$0xff] }
 0x4c4   : > { %2402 = vmatmul.msk.bf16.vlgmr.msrb.gmra.mxu3 %vm1033_vm7, %v1068_v25 }
 0x4c8   : > { %v1361_v34 = vpop.xlane.xlu1 %1360 }
 0x4c9   : > { %v1364_v42 = vsub.f32 %v3313_v44, %v1361_v34 }
 0x4cb   : > { %v1369_v43 = vmul.f32 1.442695, %v1364_v42  ;;  %v2622_v42 = vld [vmem:[%s3129_s23 + $0x38] sm:$0xff] }
 0x4cc   : > { %1537 = vmatpush.bf16.msra.mxu2 %v2622_v42 }
 0x4cd   : > { %2795 = vpow2.f32 %v1369_v43  ;;  %v2621_v43 = vld [vmem:[%s3129_s23 + $0x30] sm:$0xff] }
 0x4ce   : > { %2797 = vpow2.f32 %v1365_v39 }
 0x4d0   : > { %1538 = vmatpush.bf16.msra.mxu2 %v2621_v43 }
 0x4d1   : > { %1285 = vrot.lane.b32.xlu0 %v3247_v46, %s2951_s27  ;;  %v1264_v46 = vmul.f32 1.442695, %v1259_v50 }
 0x4d3   : > { %v3364_v45 = vpop.eup %2795  ;;  %2799 = vpow2.f32 %v1264_v46 }
 0x4d4   : > { %2403 = vmatmul.msk.bf16.gmra.mxu3 %vm1033_vm7, %v1069_v41  ;;  %v1377_v49 = vsel %vm1040_vm8, %v3364_v45, 0.0  ;;  %v2798_v51 = vpop.eup %2797  ;;  %1539 = vmatpush.bf16.msra.mxu2 %v2620_v47  ;;  %v2506_v47 = vld [vmem:[%s3139_s22 + $0x70] sm:$0xf] }
 0x4d5   : > { %v1371_v52 = vsel %vm1033_vm7, %v2798_v51, 0.0 }
 0x4d9   : > { %v2800_v44 = vpop.eup %2799 }
 0x4da   : > { %v1272_v55 = vsel %vm1040_vm8, %v2800_v44, 0.0 }
 0x4eb   : > { %1378 = vadd.xlane.f32.xlu1 %v1377_v49 }
 0x4ed   : > { %v1161_v53 = vpop.xlane.xlu0 %1160 }
 0x4ee   : > { %2801 = vrcp.f32 %v1161_v53  ;;  %v2618_v53 = vld [vmem:[%s3129_s23 + $0x18] sm:$0xff] }
 0x4f4   : > { %v2802_v56 = vpop.eup %2801 }
 0x4f5   : > { %v1171_v58 = vmul.f32 %v2802_v56, %v3325_v59  ;;  %v2615_v56 = vld [vmem:[%s3129_s23] sm:$0xff] }
 0x4fb   : > { %1372 = vadd.xlane.f32.xlu0 %v1371_v52  ;;  %v1268_v62 = vpop.xlane.xlu0 %1267 }
 0x503   : > { %1273 = vadd.xlane.f32.xlu0 %v1272_v55  ;;  %v1164_v38 = vpop.xlane.xlu2 %1163  ;;  %v2617_v55 = vld [vmem:[%s3129_s23 + $0x10] sm:$0xff] }
 0x504   : > { %2803 = vrcp.f32 %v1164_v38  ;;  %v2616_v38 = vld [vmem:[%s3129_s23 + $0x8] sm:$0xff] }
 0x50a   : > { %v2804_v57 = vpop.eup %2803 }
 0x50b   : > { %v1172_v35 = vmul.f32 %v2804_v57, %v3336_v15  ;;  %v1271_v61 = vpop.xlane.xlu2 %1270 }
 0x50d   : > { %v1174_v60 = vpack.c.bf16 %v1172_v35, %v1171_v58 }
 0x50f   : > { %2406 = vmatmul.msk.bf16.vlgmr.msrb.gmra.mxu1 %vm1033_vm7, %v1174_v60 }
 0x513   : > { %v1284_v0 = vpop.permute.xlu2 %1283 }
 0x51b   : > { %v1376_v63 = vpop.xlane.xlu1 %1375  ;;  %v1389_v7 = vpop.permute.xlu2 %1388 }
 0x530   : > { %v1167_v1 = vpop.xlane.xlu0 %1166 }
 0x531   : > { %2805 = vrcp.f32 %v1167_v1 }
 0x532   : > { %2807 = vrcp.f32 %v1271_v61 }
 0x533   : > { %v1391_v2 = vpop.permute.xlu1 %1390  ;;  %2809 = vrcp.f32 %v1268_v62 }
 0x534   : > { %v1400_v3 = vand.u32 %v1391_v2, %v3250_v48  ;;  %2811 = vrcp.f32 %v1376_v63 }
 0x536   : > { %1408 = vmatpush.bf16.msra.mxu1 %v1400_v3 }
 0x537   : > { %v2806_v4 = vpop.eup %2805 }
 0x538   : > { %v1173_v6 = vmul.f32 %v2806_v4, %v2788_v30  ;;  %v2808_v9 = vpop.eup %2807 }
 0x539   : > { %v2810_v11 = vpop.eup %2809  ;;  %v1279_v15 = vmul.f32 %v2808_v9, %v3340_v21 }
 0x53a   : > { %1409 = vmatpush.bf16.msra.mxu1 %v1389_v7  ;;  %v1175_v59 = vpack.c.bf16 %v1173_v6, %v1173_v6  ;;  %v1278_v14 = vmul.f32 %v2810_v11, %v3330_v5 }
 0x53c   : > { %2407 = vmatmul.msk.bf16.gmra.mxu1 %vm1033_vm7, %v1175_v59  ;;  %v1281_v16 = vpack.c.bf16 %v1279_v15, %v1278_v14 }
 0x543   : > { %v1286_v8 = vpop.permute.xlu0 %1285 }
 0x544   : > { %v1295_v10 = vand.u32 %v1286_v8, %v3250_v48  ;;  %v2812_v48 = vpop.eup %2811 }
 0x545   : > { %v1384_v21 = vmul.f32 %v2812_v48, %v3344_v20  ;;  %v2849_v48 = vld [vmem:[#allocation2 + $0x10] sm:$0xff] }
 0x546   : > { %1303 = vmatpush.bf16.msra.mxu3 %v1295_v10 }
 0x547   : > { %v3379_v13 = vpop.f32.mrf.mxu3 }
 0x54a   : > { %1304 = vmatpush.bf16.msra.mxu3 %v1284_v0 }
 0x54d   : > { %2410 = vmatmul.msk.bf16.vlgmr.msra.gmra.mxu3 %vm1033_vm7, %v1281_v16 }
 0x54f   : > { %v3383_v17 = vpop.f32.mrf.mxu3 }
 0x557   : > { %v3385_v18 = vpop.f32.mrf.mxu3 }
 0x55e   : > { %v1379_v5 = vpop.xlane.xlu1 %1378 }
 0x55f   : > { %v1097_v19 = vpop.f32.mrf.mxu3 }
 0x56e   : > { %v1373_v23 = vpop.xlane.xlu0 %1372 }
 0x56f   : > { %2813 = vrcp.f32 %v1373_v23 }
 0x575   : > { %v2814_v24 = vpop.eup %2813 }
 0x576   : > { %v1383_v26 = vmul.f32 %v2814_v24, %v2798_v51  ;;  %v1274_v27 = vpop.xlane.xlu0 %1273 }
 0x577   : > { %2815 = vrcp.f32 %v1274_v27 }
 0x578   : > { %v1386_v28 = vpack.c.bf16 %v1384_v21, %v1383_v26  ;;  %2817 = vrcp.f32 %v1379_v5  ;;  %v2850_v26 = vld [vmem:[#allocation2] sm:$0xff] }
 0x57a   : > { %2414 = vmatmul.msk.bf16.vlgmr.msra.gmra.mxu1 %vm1033_vm7, %v1386_v28 }
 0x57d   : > { %v2816_v29 = vpop.eup %2815 }
 0x57e   : > { %v1280_v30 = vmul.f32 %v2816_v29, %v2800_v44  ;;  %v2818_v32 = vpop.eup %2817  ;;  %v2619_v44 = vld [vmem:[%s3129_s23 + $0x20] sm:$0xff]  ;;  %v2851_v29 = vld [vmem:[#allocation2 + $0x8] sm:$0x1] }
 0x57f   : > { %v1385_v22 = vmul.f32 %v2818_v32, %v3364_v45  ;;  %1540 = vmatpush.bf16.msra.mxu2 %v2619_v44  ;;  %v2636_v44 = vld [vmem:[%s3139_s22 + $0x64] sm:$0xf0] }
 0x580   : > { %v1282_v31 = vpack.c.bf16 %v1280_v30, %v1280_v30 }
 0x581   : > { %v1387_v33 = vpack.c.bf16 %v1385_v22, %v1385_v22 }
 0x582   : > { %2411 = vmatmul.msk.bf16.gmra.mxu3 %vm1033_vm7, %v1282_v31 }
 0x583   : > { %1541 = vmatpush.bf16.msra.mxu2 %v2618_v53  ;;  %v2635_v53 = vld [vmem:[%s3139_s22 + $0x64] sm:$0xf] }
 0x587   : > { %1542 = vmatpush.bf16.msra.mxu2 %v2617_v55 }
 0x58a   : > { %2415 = vmatmul.msk.bf16.gmra.mxu1 %vm1033_vm7, %v1387_v33 }
 0x58b   : > { %1543 = vmatpush.bf16.msra.mxu2 %v2616_v38  ;;  %v2500_v38 = vld [vmem:[%s3139_s22 + $0x68] sm:$0xf0] }
 0x58c   : > { %v1201_v20 = vpop.f32.mrf.mxu1 }
 0x58f   : > { %1544 = vmatpush.bf16.msra.mxu2 %v2615_v56  ;;  %v2503_v56 = vor.u32 %v2635_v53, %v2500_v38  ;;  %v1558_v53 = vld [vmem:[%s3693_s30] sm:$0x3] }
 0x594   : > { %v1203_v36 = vpop.f32.mrf.mxu1 }
 0x595   : > { %v2746_v25 = vpack.i.bf16 %v1203_v36, %v1201_v20 }
 0x597   : > { %2747 = vrot.lane.b32.xlu2 %v2746_v25, %s2953_s28 }
 0x5b9   : > { %v1206_v37 = vpop.f32.mrf.mxu1 }
 0x5c1   : > { %v1208_v54 = vpop.f32.mrf.mxu1 }
 0x5d0   : > { %v1306_v40 = vpop.f32.mrf.mxu3 }
 0x5d8   : > { %v1308_v41 = vpop.f32.mrf.mxu3 }
 0x5d9   : > { %v2751_v34 = vpack.i.bf16 %v1308_v41, %v1306_v40 }
 0x5db   : > { %2752 = vrot.lane.b32.xlu0 %v2751_v34, %s2951_s27 }
 0x5f1   : > { %v2748_v57 = vpop.permute.xlu2 %2747 }
 0x5f2   : > { %v2750_v35 = vunpack.i.h.bf16 %v2748_v57  ;;  %v2749_v60 = vunpack.i.l.bf16 %v2748_v57  ;;  %v2490_v57 = vld [vmem:[%s3139_s22 + $0x50] sm:$0xf] }
 0x5f4   : > { %v1457_v0 = vsel %vm1002_vm6, %v3383_v17, %v2750_v35  ;;  %v1456_v1 = vsel %vm1002_vm6, %v3379_v13, %v2749_v60  ;;  %v2761_v17 = vld [vmem:[%s3692_s25] ss:$0 sm:$0xff]  ;;  %v2633_v35 = vld [vmem:[%s3139_s22 + $0x54] sm:$0xf] }
 0x5f7   : > { %v1411_v45 = vpop.f32.mrf.mxu1 }
 0x5ff   : > { %v1413_v49 = vpop.f32.mrf.mxu1 }
 0x600   : > { %v2756_v39 = vpack.i.bf16 %v1413_v49, %v1411_v45  ;;  %v2638_v49 = vld [vmem:[%s3139_s22 + $0x74] sm:$0xf0] }
 0x602   : > { %2757 = vrot.lane.b32.xlu2 %v2756_v39, %s2950_s29  ;;  %v2637_v39 = vld [vmem:[%s3139_s22 + $0x74] sm:$0xf] }
 0x605   : > { %v1311_v50 = vpop.f32.mrf.mxu3 }
 0x606   : > { %1439 = vrot.lane.b32.xlu0 %v1311_v50, %s2951_s27  ;;  %v2507_v50 = vor.u32 %v2638_v49, %v2506_v47 }
 0x607   : > { %v1416_v46 = vpop.f32.mrf.mxu1 }
 0x608   : > { %1733 = vmatpush.bf16.msrb.mxu3 %v2507_v50 }
 0x60a   : > { %1427 = vrot.lane.b32.xlu2 %v1206_v37, %s2953_s28 }
 0x60d   : > { %v1313_v51 = vpop.f32.mrf.mxu3 }
 0x60f   : > { %v1418_v52 = vpop.f32.mrf.mxu1 }
 0x610   : > { %v2498_v52 = vld [vmem:[%s3139_s22 + $0x60] sm:$0xf] }
 0x611   : > { %v2499_v55 = vor.u32 %v2636_v44, %v2498_v52 }
 0x612   : > { %1451 = vrot.lane.b32.xlu2 %v1416_v46, %s2950_s29  ;;  %v2508_v46 = vld [vmem:[%s3139_s22 + $0x78] sm:$0xf0] }
 0x613   : > { %v2511_v51 = vor.u32 %v2637_v39, %v2508_v46  ;;  %1734 = vmatpush.bf16.msrb.mxu3 %v2499_v55 }
 0x615   : > { %1751 = vmatpush.bf16.msrb.mxu0 %v2511_v51 }
 0x619   : > { %1752 = vmatpush.bf16.msrb.mxu0 %v2503_v56  ;;  %v1621_v56 = vperm.slane %v1558_v53, 0 }
 0x64d   : > { %v2753_v58 = vpop.permute.xlu0 %2752 }
 0x64e   : > { %v2755_v61 = vunpack.i.h.bf16 %v2753_v58  ;;  %v2754_v62 = vunpack.i.l.bf16 %v2753_v58  ;;  %v2634_v58 = vld [vmem:[%s3139_s22 + $0x54] sm:$0xf0] }
 0x64f   : > { %v2491_v60 = vor.u32 %v2634_v58, %v2490_v57 }
 0x650   : > { %v1460_v4 = vsel %vm1459_vm9, %v1456_v1, %v2754_v62  ;;  %v1461_v6 = vsel %vm1459_vm9, %v1457_v0, %v2755_v61  ;;  %v2492_v61 = vld [vmem:[%s3139_s22 + $0x58] sm:$0xf0]  ;;  %v2632_v0 = vld [vmem:[%s3139_s22 + $0x44] sm:$0xf0]  ;;  %v2631_v1 = vld [vmem:[%s3139_s22 + $0x44] sm:$0xf] }
 0x651   : > { %v2495_v62 = vor.u32 %v2633_v35, %v2492_v61  ;;  %1735 = vmatpush.bf16.msrb.mxu3 %v2491_v60 }
 0x653   : > { %1753 = vmatpush.bf16.msrb.mxu0 %v2495_v62 }
 0x65c   : > { %v2758_v63 = vpop.permute.xlu2 %2757 }
 0x65d   : > { %v2760_v2 = vunpack.i.h.bf16 %v2758_v63  ;;  %v2759_v3 = vunpack.i.l.bf16 %v2758_v63  ;;  %v2482_v63 = vld [vmem:[%s3139_s22 + $0x40] sm:$0xf] }
 0x65f   : > { %v1464_v7 = vsel %vm1463_vm10, %v1460_v4, %v2759_v3  ;;  %v1465_v59 = vsel %vm1463_vm10, %v1461_v6, %v2760_v2  ;;  %v2483_v2 = vor.u32 %v2632_v0, %v2482_v63  ;;  %v2484_v3 = vld [vmem:[%s3139_s22 + $0x48] sm:$0xf0]  ;;  %v2474_v6 = vld [vmem:[%s3139_s22 + $0x30] sm:$0xf]  ;;  %v1625_v63 = vperm.slane %v1558_v53, 1 }
 0x660   : > { %v1467_v8 = vpack.c.bf16 %v1465_v59, %v1464_v7  ;;  %v2487_v4 = vor.u32 %v2631_v1, %v2484_v3  ;;  %v2630_v7 = vld [vmem:[%s3139_s22 + $0x34] sm:$0xf0]  ;;  %v2629_v59 = vld [vmem:[%s3139_s22 + $0x34] sm:$0xf] }
 0x661   : > { %1736 = vmatpush.bf16.msrb.mxu3 %v2483_v2 }
 0x662   : > { %1545 = vmatmul.bf16.vlgmr.msra.gmra.mxu2 %v1467_v8  ;;  %1754 = vmatpush.bf16.msrb.mxu0 %v2487_v4  ;;  %v2475_v8 = vor.u32 %v2630_v7, %v2474_v6 }
 0x664   : > { %v1428_v9 = vpop.permute.xlu2 %1427 }
 0x665   : > { %v1458_v10 = vsel %vm1002_vm6, %v3385_v18, %v1428_v9  ;;  %v2476_v9 = vld [vmem:[%s3139_s22 + $0x38] sm:$0xf0]  ;;  %1737 = vmatpush.bf16.msrb.mxu3 %v2475_v8 }
 0x66c   : > { %v1452_v15 = vpop.permute.xlu2 %1451 }
 0x678   : > { %v1440_v11 = vpop.permute.xlu0 %1439 }
 0x679   : > { %v1462_v13 = vsel %vm1459_vm9, %v1458_v10, %v1440_v11  ;;  %v2479_v10 = vor.u32 %v2629_v59, %v2476_v9  ;;  %v2466_v11 = vld [vmem:[%s3139_s22 + $0x20] sm:$0xf] }
 0x67a   : > { %v1466_v14 = vsel %vm1463_vm10, %v1462_v13, %v1452_v15  ;;  %v2628_v15 = vld [vmem:[%s3139_s22 + $0x24] sm:$0xf0]  ;;  %v2627_v13 = vld [vmem:[%s3139_s22 + $0x24] sm:$0xf] }
 0x67b   : > { %v1468_v16 = vpack.c.bf16 %v1466_v14, %v1466_v14  ;;  %1755 = vmatpush.bf16.msrb.mxu0 %v2479_v10  ;;  %v2467_v14 = vor.u32 %v2628_v15, %v2466_v11 }
 0x67d   : > { %1550 = vmatmul.bf16.gmra.mxu2 %v1468_v16  ;;  %v2468_v16 = vld [vmem:[%s3139_s22 + $0x28] sm:$0xf0]  ;;  %1738 = vmatpush.bf16.msrb.mxu3 %v2467_v14  ;;  %v2653_v14 = vld [vmem:[%s3148_s20 + $0x70] sm:$0xff] }
 0x6e5   : > { %v1546_v19 = vpop.f32.mrf.mxu2 }
 0x6e6   : > { %v1547_v23 = vadd.f32 %v2761_v17, %v1546_v19  ;;  %v2458_v19 = vld [vmem:[%s3139_s22 + $0x10] sm:$0xf] }
 0x6e8   : > { %v3423_v24 = vadd.f32 %v2849_v48, %v1547_v23  ;;  %v2626_v23 = vld [vmem:[%s3139_s22 + $0x14] sm:$0xf0]  ;;  %v2625_v48 = vld [vmem:[%s3139_s22 + $0x14] sm:$0xf] }
 0x6ea   : > { %1559 = vadd.xlane.f32.xlu0 %v3423_v24 }
 0x6ed   : > { %v1548_v18 = vpop.f32.mrf.mxu2 }
 0x6ee   : > { %v1549_v21 = vadd.f32 %v2761_v17, %v1548_v18  ;;  %v2459_v18 = vor.u32 %v2626_v23, %v2458_v19  ;;  %v2645_v19 = vld [vmem:[%s3148_s20 + $0x30] sm:$0xff]  ;;  %v2651_v23 = vld [vmem:[%s3148_s20 + $0x60] sm:$0xff] }
 0x6f0   : > { %v3426_v27 = vadd.f32 %v2850_v26, %v1549_v21  ;;  %v2460_v21 = vld [vmem:[%s3139_s22 + $0x18] sm:$0xf0]  ;;  %1739 = vmatpush.bf16.msrb.mxu3 %v2459_v18  ;;  %v2644_v18 = vld [vmem:[%s3148_s20 + $0x28] sm:$0xff] }
 0x6f2   : > { %1561 = vadd.xlane.f32.xlu2 %v3426_v27 }
 0x700   : > { %v1551_v5 = vpop.f32.mrf.mxu2 }
 0x701   : > { %v1552_v28 = vadd.f32 %v2761_v17, %v1551_v5  ;;  %v2471_v17 = vor.u32 %v2627_v13, %v2468_v16  ;;  %v2463_v5 = vor.u32 %v2625_v48, %v2460_v21  ;;  %v2654_v13 = vld [vmem:[%s3148_s20 + $0x78] sm:$0xff] }
 0x702   : > { %2045 = vmatpush.bf16.msrb.mxu2 %v2654_v13  ;;  %v2646_v16 = vld [vmem:[%s3148_s20 + $0x38] sm:$0xff] }
 0x703   : > { %v3429_v30 = vadd.f32 %v2851_v29, %v1552_v28  ;;  %1756 = vmatpush.bf16.msrb.mxu0 %v2471_v17  ;;  %v2450_v29 = vld [vmem:[%s3139_s22] sm:$0xf]  ;;  %2027 = vmatpush.bf16.msrb.mxu1 %v2646_v16  ;;  %v2652_v17 = vld [vmem:[%s3148_s20 + $0x68] sm:$0xff]  ;;  %v2650_v21 = vld [vmem:[%s3148_s20 + $0x58] sm:$0xff] }
 0x705   : > { %v1563_v31 = vsel %vm698_vm11, %v3429_v30, 0.0 }
 0x706   : > { %1564 = vadd.xlane.f32.xlu1 %v1563_v31  ;;  %v2624_v31 = vld [vmem:[%s3139_s22 + $0x4] sm:$0xf0]  ;;  %2046 = vmatpush.bf16.msrb.mxu2 %v2653_v14 }
 0x707   : > { %1757 = vmatpush.bf16.msrb.mxu0 %v2463_v5  ;;  %2028 = vmatpush.bf16.msrb.mxu1 %v2645_v19 }
 0x708   : > { %v1553_v32 = vpop.f32.mrf.mxu2 }
 0x709   : > { %v2623_v32 = vld [vmem:[%s3139_s22 + $0x4] sm:$0xf] }
 0x70a   : > { %2047 = vmatpush.bf16.msrb.mxu2 %v2652_v17 }
 0x70b   : > { %2029 = vmatpush.bf16.msrb.mxu1 %v2644_v18 }
 0x70e   : > { %2048 = vmatpush.bf16.msrb.mxu2 %v2651_v23 }
 0x712   : > { %2049 = vmatpush.bf16.msrb.mxu2 %v2650_v21 }
 0x75d   : > { %v1560_v22 = vpop.xlane.xlu0 %1559 }
 0x75e   : > { %v1566_v33 = vmul.f32 %v1560_v22, %v3163_v12 }
 0x760   : > { %v3435_v20 = vsub.f32 %v3423_v24, %v1566_v33  ;;  %v2451_v33 = vor.u32 %v2624_v31, %v2450_v29 }
 0x762   : > { %v1572_v36 = vmul.f32 %v3435_v20, %v3435_v20  ;;  %1740 = vmatpush.bf16.msrb.mxu3 %v2451_v33  ;;  %v2642_v33 = vld [vmem:[%s3148_s20 + $0x18] sm:$0xff] }
 0x764   : > { %1575 = vadd.xlane.f32.xlu1 %v1572_v36  ;;  %v2452_v36 = vld [vmem:[%s3139_s22 + $0x8] sm:$0xf0] }
 0x765   : > { %v1562_v25 = vpop.xlane.xlu2 %1561 }
 0x766   : > { %v1567_v37 = vmul.f32 %v1562_v25, %v3163_v12  ;;  %v2455_v25 = vor.u32 %v2623_v32, %v2452_v36  ;;  %v2649_v32 = vld [vmem:[%s3148_s20 + $0x50] sm:$0xff] }
 0x767   : > { %2050 = vmatpush.bf16.msrb.mxu2 %v2649_v32 }
 0x768   : > { %v3441_v54 = vsub.f32 %v3426_v27, %v1567_v37  ;;  %1758 = vmatpush.bf16.msrb.mxu0 %v2455_v25 }
 0x76a   : > { %v1573_v40 = vmul.f32 %v3441_v54, %v3441_v54 }
 0x76c   : > { %1577 = vadd.xlane.f32.xlu1 %v1573_v40 }
 0x779   : > { %v1565_v41 = vpop.xlane.xlu1 %1564 }
 0x77a   : > { %v1568_v34 = vmul.f32 %v1565_v41, %v3163_v12 }
 0x77c   : > { %v3447_v42 = vsub.f32 %v3429_v30, %v1568_v34 }
 0x77e   : > { %v1574_v43 = vmul.f32 %v3447_v42, %v3447_v42 }
 0x780   : > { %v1579_v45 = vsel %vm698_vm11, %v1574_v43, 0.0 }
 0x781   : > { %1580 = vadd.xlane.f32.xlu1 %v1579_v45 }
 0x7d7   : > { %v1576_v26 = vpop.xlane.xlu1 %1575 }
 0x7d8   : > { %v1582_v28 = vmul.f32 %v1576_v26, %v3163_v12 }
 0x7da   : > { %v1585_v22 = vadd.f32 1e-05, %v1582_v28  ;;  %v2643_v28 = vld [vmem:[%s3148_s20 + $0x20] sm:$0xff] }
 0x7db   : > { %2030 = vmatpush.bf16.msrb.mxu1 %v2643_v28 }
 0x7dc   : > { %2819 = vrsqrt.f32 %v1585_v22  ;;  %vm1594_vm12 = vweird.f32 %v1585_v22 }
 0x7df   : > { %v1578_v37 = vpop.xlane.xlu1 %1577  ;;  %2031 = vmatpush.bf16.msrb.mxu1 %v2642_v33 }
 0x7e0   : > { %v1583_v40 = vmul.f32 %v1578_v37, %v3163_v12  ;;  %v2648_v37 = vld [vmem:[%s3148_s20 + $0x48] sm:$0xff] }
 0x7e1   : > { %2051 = vmatpush.bf16.msrb.mxu2 %v2648_v37 }
 0x7e2   : > { %v2820_v41 = vpop.eup %2819  ;;  %v1586_v34 = vadd.f32 1e-05, %v1583_v40 }
 0x7e3   : > { %v1589_v43 = vmul.f32 %v2820_v41, %v1585_v22  ;;  %vm1595_vm11 = vweird.f32 %v2820_v41 }
 0x7e4   : > { %2821 = vrsqrt.f32 %v1586_v34  ;;  %vm1596_vm13 = vmor %vm1594_vm12, %vm1595_vm11  ;;  %vm1604_vm15 = vweird.f32 %v1586_v34 }
 0x7e5   : > { %v1590_v45 = vmul.f32 %v2820_v41, %v1589_v43  ;;  %v2641_v43 = vld [vmem:[%s3148_s20 + $0x10] sm:$0xff] }
 0x7e6   : > { %2032 = vmatpush.bf16.msrb.mxu1 %v2641_v43 }
 0x7e7   : > { %v1591_v47 = vmul.f32 0.5, %v1590_v45 }
 0x7e9   : > { %v1592_v49 = vsub.f32 1.5, %v1591_v47 }
 0x7ea   : > { %v2822_v39 = vpop.eup %2821 }
 0x7eb   : > { %v1593_v50 = vmul.f32 %v2820_v41, %v1592_v49  ;;  %v1599_v46 = vmul.f32 %v2822_v39, %v1586_v34  ;;  %vm1605_vm14 = vweird.f32 %v2822_v39  ;;  %v2647_v49 = vld [vmem:[%s3148_s20 + $0x40] sm:$0xff] }
 0x7ec   : > { %vm1606_vm0 = vmor %vm1604_vm15, %vm1605_vm14  ;;  %2052 = vmatpush.bf16.msrb.mxu2 %v2647_v49 }
 0x7ed   : > { %v1600_v51 = vmul.f32 %v2822_v39, %v1599_v46  ;;  %v1597_v52 = vsel %vm1596_vm13, %v2820_v41, %v1593_v50  ;;  %v2640_v46 = vld [vmem:[%s3148_s20 + $0x8] sm:$0xff] }
 0x7ee   : > { %v1618_v38 = vmul.f32 %v1597_v52, %v3435_v20  ;;  %2033 = vmatpush.bf16.msrb.mxu1 %v2640_v46 }
 0x7ef   : > { %v1601_v44 = vmul.f32 0.5, %v1600_v51 }
 0x7f0   : > { %v1622_v62 = vmul.f32 %v1621_v56, %v1618_v38 }
 0x7f1   : > { %v1602_v55 = vsub.f32 1.5, %v1601_v44 }
 0x7f2   : > { %v1626_v2 = vadd.f32 %v1625_v63, %v1622_v62 }
 0x7f3   : > { %v1603_v57 = vmul.f32 %v2822_v39, %v1602_v55  ;;  %v2639_v55 = vld [vmem:[%s3148_s20] sm:$0xff] }
 0x7f4   : > { %v1581_v58 = vpop.xlane.xlu1 %1580  ;;  %2034 = vmatpush.bf16.msrb.mxu1 %v2639_v55 }
 0x7f5   : > { %v1607_v35 = vsel %vm1606_vm0, %v2822_v39, %v1603_v57  ;;  %v1584_v60 = vmul.f32 %v1581_v58, %v3163_v12 }
 0x7f6   : > { %v1619_v61 = vmul.f32 %v1607_v35, %v3441_v54 }
 0x7f7   : > { %v1587_v0 = vadd.f32 1e-05, %v1584_v60 }
 0x7f8   : > { %v1623_v1 = vmul.f32 %v1621_v56, %v1619_v61 }
 0x7f9   : > { %2823 = vrsqrt.f32 %v1587_v0  ;;  %vm1614_vm2 = vweird.f32 %v1587_v0 }
 0x7fa   : > { %v1627_v3 = vadd.f32 %v1625_v63, %v1623_v1 }
 0x7fc   : > { %v1629_v4 = vpack.c.bf16 %v1627_v3, %v1626_v2 }
 0x7fe   : > { %1741 = vmatmul.bf16.vlgmr.msrb.gmra.mxu3 %v1629_v4  ;;  %1759 = vmatmul.bf16.vlgmr.msrb.gmra.mxu0 %v1629_v4 }
 0x7ff   : > { %v2824_v20 = vpop.eup %2823 }
 0x800   : > { %v1609_v6 = vmul.f32 %v2824_v20, %v1587_v0  ;;  %vm1615_vm1 = vweird.f32 %v2824_v20 }
 0x801   : > { %vm1616_vm3 = vmor %vm1614_vm2, %vm1615_vm1 }
 0x802   : > { %v1610_v7 = vmul.f32 %v2824_v20, %v1609_v6 }
 0x804   : > { %v1611_v59 = vmul.f32 0.5, %v1610_v7 }
 0x806   : > { %v1612_v8 = vsub.f32 1.5, %v1611_v59 }
 0x808   : > { %v1613_v12 = vmul.f32 %v2824_v20, %v1612_v8 }
 0x80a   : > { %v1617_v54 = vsel %vm1616_vm3, %v2824_v20, %v1613_v12 }
 0x80b   : > { %v1620_v9 = vmul.f32 %v1617_v54, %v3447_v42  ;;  %v1647_v42 = vld [vmem:[%s591_s11] sm:$0x3] }
 0x80c   : > { %v1650_v48 = vperm.slane %v1647_v42, 1  ;;  %v1649_v31 = vperm.slane %v1647_v42, 0 }
 0x80d   : > { %v1624_v10 = vmul.f32 %v1621_v56, %v1620_v9 }
 0x80f   : > { %v1628_v11 = vadd.f32 %v1625_v63, %v1624_v10 }
 0x811   : > { %v1630_v15 = vpack.c.bf16 %v1628_v11, %v1628_v11 }
 0x813   : > { %1746 = vmatmul.bf16.gmra.mxu3 %v1630_v15  ;;  %1764 = vmatmul.bf16.gmra.mxu0 %v1630_v15 }
 0x87b   : > { %v1760_v26 = vpop.f32.mrf.mxu0 }
 0x87c   : > { %v3508_v5 = vadd.f32 %v1760_v26, %v1650_v48 }
 0x87e   : > { %v2513_v29 = vmul.f32 -1.702, %v3508_v5 }
 0x880   : > { %v1783_v22 = vmul.f32 1.442695, %v2513_v29 }
 0x881   : > { %v1742_v36 = vpop.f32.mrf.mxu3 }
 0x882   : > { %2825 = vpow2.f32 %v1783_v22  ;;  %v3514_v25 = vadd.f32 %v1742_v36, %v1649_v31 }
 0x883   : > { %v1762_v40 = vpop.f32.mrf.mxu0 }
 0x884   : > { %v2512_v41 = vmul.f32 -1.702, %v3514_v25  ;;  %v3518_v34 = vadd.f32 %v1762_v40, %v1650_v48 }
 0x886   : > { %v1781_v45 = vmul.f32 1.442695, %v2512_v41  ;;  %v2515_v47 = vmul.f32 -1.702, %v3518_v34 }
 0x888   : > { %v2826_v39 = vpop.eup %2825  ;;  %2827 = vpow2.f32 %v1781_v45  ;;  %v1787_v50 = vmul.f32 1.442695, %v2515_v47 }
 0x889   : > { %v1794_v51 = vadd.f32 1.0, %v2826_v39  ;;  %v1744_v52 = vpop.f32.mrf.mxu3 }
 0x88a   : > { %2829 = vpow2.f32 %v1787_v50  ;;  %v3524_v44 = vadd.f32 %v1744_v52, %v1649_v31 }
 0x88b   : > { %2831 = vrcp.f32 %v1794_v51  ;;  %v1823_v54 = vand.u32 2147483647, %v1794_v51  ;;  %v1825_v10 = vand.u32 2147483648, %v1794_v51  ;;  %vm1819_vm5 = vweird.f32 %v1794_v51 }
 0x88c   : > { %v2514_v53 = vmul.f32 -1.702, %v3524_v44 }
 0x88d   : > { %vm3545_vm6 = vcmp.eq.f32.partialorder %v1823_v54, 8.507059e+37 }
 0x88e   : > { %v2828_v38 = vpop.eup %2827  ;;  %v1785_v56 = vmul.f32 1.442695, %v2514_v53 }
 0x88f   : > { %v3528_v57 = vadd.f32 1.0, %v2828_v38 }
 0x890   : > { %v2830_v58 = vpop.eup %2829  ;;  %2833 = vpow2.f32 %v1785_v56  ;;  %v1765_v35 = vpop.f32.mrf.mxu0 }
 0x891   : > { %v2832_v60 = vpop.eup %2831  ;;  %2835 = vrcp.f32 %v3528_v57  ;;  %v1796_v62 = vadd.f32 1.0, %v2830_v58  ;;  %v3531_v63 = vadd.f32 %v1765_v35, %v1650_v48  ;;  %v1826_v48 = vor.u32 1.1754944e-38, %v1825_v10 }
 0x892   : > { %v1815_v61 = vmul.f32 %v2832_v60, %v1794_v51  ;;  %vm1820_vm4 = vweird.f32 %v2832_v60  ;;  %vm1804_vm8 = vweird.f32 %v3528_v57  ;;  %v1808_v33 = vand.u32 2147483647, %v3528_v57 }
 0x893   : > { %2837 = vrcp.f32 %v1796_v62  ;;  %v2517_v1 = vmul.f32 -1.702, %v3531_v63  ;;  %vm3549_vm7 = vmor %vm1819_vm5, %vm1820_vm4  ;;  %v1853_v18 = vand.u32 2147483647, %v1796_v62  ;;  %v1855_v21 = vand.u32 2147483648, %v1796_v62 }
 0x894   : > { %v1816_v0 = vsub.f32 1.0, %v1815_v61  ;;  %v1810_v37 = vand.u32 2147483648, %v3528_v57  ;;  %vm1849_vm11 = vweird.f32 %v1796_v62  ;;  %vm1809_vm0 = vcmp.eq.f32.partialorder %v1808_v33, 8.507059e+37 }
 0x895   : > { %v1791_v7 = vmul.f32 1.442695, %v2517_v1  ;;  %vm1854_vm13 = vcmp.eq.f32.partialorder %v1853_v18, 8.507059e+37  ;;  %v1856_v45 = vor.u32 1.1754944e-38, %v1855_v21 }
 0x896   : > { %v2834_v2 = vpop.eup %2833  ;;  %v1747_v3 = vpop.f32.mrf.mxu3  ;;  %v1817_v20 = vmul.f32 %v2832_v60, %v1816_v0  ;;  %v1811_v56 = vor.u32 1.1754944e-38, %v1810_v37 }
 0x897   : > { %v3534_v4 = vpop.eup %2835  ;;  %v3536_v6 = vadd.f32 1.0, %v2834_v2  ;;  %v3538_v59 = vadd.f32 %v1747_v3, %v1649_v31 }
 0x898   : > { %v1800_v8 = vmul.f32 %v3534_v4, %v3528_v57  ;;  %v1767_v12 = vpop.f32.mrf.mxu0  ;;  %v1818_v13 = vadd.f32 %v2832_v60, %v1817_v20  ;;  %vm1805_vm10 = vweird.f32 %v3534_v4 }
 0x899   : > { %2839 = vrcp.f32 %v3536_v6  ;;  %v2838_v9 = vpop.eup %2837  ;;  %v2516_v15 = vmul.f32 -1.702, %v3538_v59  ;;  %vm3565_vm14 = vmor %vm1804_vm8, %vm1805_vm10  ;;  %v1838_v50 = vand.u32 2147483647, %v3536_v6  ;;  %v1840_v46 = vand.u32 2147483648, %v3536_v6 }
 0x89a   : > { %v1801_v11 = vsub.f32 1.0, %v1800_v8  ;;  %2841 = vpow2.f32 %v1791_v7  ;;  %v1845_v14 = vmul.f32 %v2838_v9, %v1796_v62  ;;  %v1822_v29 = vsel %vm3549_vm7, %v2832_v60, %v1818_v13 }
 0x89b   : > { %v1789_v17 = vmul.f32 1.442695, %v2516_v15  ;;  %vm1850_vm9 = vweird.f32 %v2838_v9  ;;  %v1827_v43 = vsel %vm3545_vm6, %v1826_v48, %v1822_v29  ;;  %vm1834_vm1 = vweird.f32 %v3536_v6 }
 0x89c   : > { %v1802_v16 = vmul.f32 %v3534_v4, %v1801_v11  ;;  %v1846_v42 = vsub.f32 1.0, %v1845_v14  ;;  %vm1851_vm12 = vmor %vm1849_vm11, %vm1850_vm9  ;;  %v1890_v38 = vmul.f32 %v1827_v43, %v3508_v5  ;;  %v1841_v62 = vor.u32 1.1754944e-38, %v1840_v46 }
 0x89d   : > { %2843 = vpow2.f32 %v1789_v17  ;;  %vm1839_vm3 = vcmp.eq.f32.partialorder %v1838_v50, 8.507059e+37 }
 0x89e   : > { %v1749_v26 = vpop.f32.mrf.mxu3  ;;  %v1847_v31 = vmul.f32 %v2838_v9, %v1846_v42  ;;  %v1803_v22 = vadd.f32 %v3534_v4, %v1802_v16 }
 0x89f   : > { %v2840_v28 = vpop.eup %2839 }
 0x8a0   : > { %v2842_v32 = vpop.eup %2841  ;;  %v1830_v36 = vmul.f32 %v2840_v28, %v3536_v6  ;;  %v1848_v40 = vadd.f32 %v2838_v9, %v1847_v31  ;;  %v1807_v52 = vsel %vm3565_vm14, %v3534_v4, %v1803_v22  ;;  %vm1835_vm15 = vweird.f32 %v2840_v28 }
 0x8a1   : > { %v1798_v41 = vadd.f32 1.0, %v2842_v32  ;;  %v1812_v60 = vsel %vm1809_vm0, %v1811_v56, %v1807_v52  ;;  %vm1836_vm2 = vmor %vm1834_vm1, %vm1835_vm15 }
 0x8a2   : > { %v1831_v47 = vsub.f32 1.0, %v1830_v36  ;;  %v1852_v39 = vsel %vm1851_vm12, %v2838_v9, %v1848_v40  ;;  %v1889_v5 = vmul.f32 %v1812_v60, %v3514_v25 }
 0x8a3   : > { %2845 = vrcp.f32 %v1798_v41  ;;  %v2844_v51 = vpop.eup %2843  ;;  %v1857_v53 = vsel %vm1854_vm13, %v1856_v45, %v1852_v39  ;;  %v1883_v8 = vand.u32 2147483647, %v1798_v41  ;;  %v1885_v6 = vand.u32 2147483648, %v1798_v41 }
 0x8a4   : > { %v1832_v55 = vmul.f32 %v2840_v28, %v1831_v47  ;;  %v1892_v57 = vmul.f32 %v1857_v53, %v3518_v34  ;;  %v1797_v58 = vadd.f32 1.0, %v2844_v51  ;;  %vm1879_vm5 = vweird.f32 %v1798_v41 }
 0x8a5   : > { %vm1884_vm7 = vcmp.eq.f32.partialorder %v1883_v8, 8.507059e+37  ;;  %v1886_v11 = vor.u32 1.1754944e-38, %v1885_v6 }
 0x8a6   : > { %v1833_v35 = vadd.f32 %v2840_v28, %v1832_v55  ;;  %v1896_v61 = vpack.c.bf16 %v1892_v57, %v1890_v38  ;;  %2847 = vrcp.f32 %v1797_v58  ;;  %v1870_v15 = vand.u32 2147483648, %v1797_v58 }
 0x8a7   : > { %vm1864_vm9 = vweird.f32 %v1797_v58 }
 0x8a8   : > { %v1837_v0 = vsel %vm1836_vm2, %v2840_v28, %v1833_v35  ;;  %2053 = vmatmul.bf16.vlgmr.msrb.gmra.mxu2 %v1896_v61  ;;  %v1871_v19 = vor.u32 1.1754944e-38, %v1870_v15 }
 0x8a9   : > { %v2846_v1 = vpop.eup %2845  ;;  %v1842_v2 = vsel %vm1839_vm3, %v1841_v62, %v1837_v0 }
 0x8aa   : > { %v1891_v3 = vmul.f32 %v1842_v2, %v3524_v44  ;;  %v1875_v34 = vmul.f32 %v2846_v1, %v1798_v41  ;;  %vm1880_vm4 = vweird.f32 %v2846_v1  ;;  %v1868_v44 = vand.u32 2147483647, %v1797_v58 }
 0x8ab   : > { %vm1881_vm6 = vmor %vm1879_vm5, %vm1880_vm4 }
 0x8ac   : > { %v1895_v4 = vpack.c.bf16 %v1891_v3, %v1889_v5  ;;  %v1876_v20 = vsub.f32 1.0, %v1875_v34  ;;  %v2848_v7 = vpop.eup %2847  ;;  %vm1869_vm11 = vcmp.eq.f32.partialorder %v1868_v44, 8.507059e+37 }
 0x8ad   : > { %v1860_v54 = vmul.f32 %v2848_v7, %v1797_v58  ;;  %vm1865_vm8 = vweird.f32 %v2848_v7 }
 0x8ae   : > { %2035 = vmatmul.bf16.vlgmr.msrb.gmra.mxu1 %v1895_v4  ;;  %v1877_v12 = vmul.f32 %v2846_v1, %v1876_v20  ;;  %vm1866_vm10 = vmor %vm1864_vm9, %vm1865_vm8 }
 0x8af   : > { %v1861_v10 = vsub.f32 1.0, %v1860_v54 }
 0x8b0   : > { %v1878_v9 = vadd.f32 %v2846_v1, %v1877_v12 }
 0x8b1   : > { %v1862_v13 = vmul.f32 %v2848_v7, %v1861_v10 }
 0x8b2   : > { %v1882_v25 = vsel %vm1881_vm6, %v2846_v1, %v1878_v9 }
 0x8b3   : > { %v1887_v14 = vsel %vm1884_vm7, %v1886_v11, %v1882_v25  ;;  %v1863_v17 = vadd.f32 %v2848_v7, %v1862_v13 }
 0x8b4   : > { %v1894_v16 = vmul.f32 %v1887_v14, %v3531_v63  ;;  %v2762_v63 = vld [vmem:[%s599_s19] ss:$0 sm:$0xff] }
 0x8b5   : > { %v1867_v42 = vsel %vm1866_vm10, %v2848_v7, %v1863_v17 }
 0x8b6   : > { %v1898_v23 = vpack.c.bf16 %v1894_v16, %v1894_v16  ;;  %v1872_v48 = vsel %vm1869_vm11, %v1871_v19, %v1867_v42 }
 0x8b7   : > { %v1893_v18 = vmul.f32 %v1872_v48, %v3538_v59 }
 0x8b8   : > { %2058 = vmatmul.bf16.gmra.mxu2 %v1898_v23 }
 0x8b9   : > { %v1897_v21 = vpack.c.bf16 %v1893_v18, %v1893_v18 }
 0x8be   : > { %2040 = vmatmul.bf16.gmra.mxu1 %v1897_v21 }
 0x92b   : > { %v2036_v26 = vpop.f32.mrf.mxu1  ;;  %v2054_v28 = vpop.f32.mrf.mxu2 }
 0x92c   : > { %v2055_v29 = vadd.f32 %v2054_v28, %v2036_v26 }
 0x92e   : > { %v2063_v31 = vadd.f32 %v2055_v29, %v3423_v24 }
 0x930   : > { %v2070_v32 = vadd.f32 %v2762_v63, %v2063_v31 }
 0x932   : > { %2073 = vst [vmem:[#allocation2 + $0x10] sm:$0xff] %v2070_v32 }
 0x933   : > { %v2038_v22 = vpop.f32.mrf.mxu1  ;;  %v2056_v33 = vpop.f32.mrf.mxu2 }
 0x934   : > { %v2057_v36 = vadd.f32 %v2056_v33, %v2038_v22 }
 0x936   : > { %v2064_v59 = vadd.f32 %v2057_v36, %v3426_v27 }
 0x938   : > { %v2071_v37 = vadd.f32 %v2762_v63, %v2064_v59 }
 0x93a   : > { %2074 = vst [vmem:[#allocation2] sm:$0xff] %v2071_v37 }
 0x93b   : > { %v2041_v40 = vpop.f32.mrf.mxu1  ;;  %v2059_v41 = vpop.f32.mrf.mxu2 }
 0x93c   : > { %v2060_v43 = vadd.f32 %v2059_v41, %v2041_v40 }
 0x93e   : > { %v2065_v45 = vadd.f32 %v2060_v43, %v3429_v30 }
 0x93f   : > { %2079 = sbr.rel (%p2582_p1) target bundleno = 2375 (0x947), region = 76 }
 0x940   : > { %v2072_v47 = vadd.f32 %v2762_v63, %v2065_v45 }
 0x942   : > { %2075 = vst [vmem:[#allocation2 + $0x8] sm:$0x1] %v2072_v47 }
 0x943   : > { %v2043_v49 = vpop.f32.mrf.mxu1  ;;  %v2061_v39 = vpop.f32.mrf.mxu2 }
 0x944   : > { %2080 = vst [vmem:[%s3154_s21 - $0x1] sm:$0xfe] %v2070_v32 }
 0x945   : > { %2081 = vst [vmem:[%s3154_s21 + $0x7] sm:$0xff] %v2071_v37 }
 0x946   : > { %2082 = vst [vmem:[%s3154_s21 + $0xf] sm:$0x1] %v2072_v47 }
 0x947 PF: > { %s3702_s19 = sld [smem:[#allocation10_spill]]  ;;  %s2096_s27 = sshll.u32 %s3154_s21, 4  ;;  %s2097_s27 = int_to_ptr.vmem [resolvable:$true] %s2096_s27 }
 0x948   : > { %s3703_s0 = sld [smem:[#allocation7_spill]] }
 0x949   : > { %s3705_s16 = sld [smem:[#allocation23_spill]] }
 0x94d   : > { %s2655_s3 = sshll.u32 %s3702_s19, 4 }
 0x94e   : > { %s3706_s23 = sand.u32 1, %s3703_s0  }
 0x94f   : > { %s2095_s29 = scalar_lea.hbm %s3705_s16, %s2655_s3  ;;  %s2084_s14 = scalar_lea.sflag [#allocation4], %s3706_s23 }
 0x950   : > { %s2098_s28 = sshll.u32 %s2095_s29, 4  ;;  %s2872_s15 = scalar_lea.hbm %s3705_s16, 32  ;;  %s2099_s28 = int_to_ptr.hbm [resolvable:$true] %s2098_s28 }
 0x951   : > { %s2866_s25 = sshra.s32 %s2099_s28, 4  ;;  %s2867_s25 = int_to_ptr.hbm [resolvable:$true] %s2866_s25 }
 0x952   : > { %s2868_s22 = scalar_lea.hbm %s2867_s25, 16  ;;  %p2873_p6 = scmp.lt.s32.totalorder %s2867_s25, %s3705_s16 }
 0x953   : > { %p2869_p2 = scmp.ne.s32.totalorder %s2867_s25, %s2868_s22  ;;  %p2874_p7 = scmp.lt.s32.totalorder %s2872_s15, %s2868_s22 }
 0x955   : > { %p2870_p4 = pnand %p2869_p2, %p3070_p3  ;;  %p2875_p8 = por %p2874_p7, %p2873_p6 }
 0x957   : > { %p2871_p5 = pneg %p2870_p4 }
 0x959   : > { %p2876_p10 = pnand %p2875_p8, %p2871_p5 }
 0x95b   : > { %2879 = shalt.err (!%p2876_p10)
}
 0x95c   : > { %s2954_s21 = smov 128   ;;  %s2955_s11 = smov 8  }
 0x95d   : > { %2659 = dma.vmem_to_hbm [thread:$0]  (%p3070_p3), %s2097_s27, 256, %s2099_s28, %s2084_s14, %s2954_s21, %s2954_s21, %s2955_s11  }
 0x95e PF: > { %s3707_s20 = sld [smem:[#allocation13_spill]] }
 0x95f   : > { %s3708_s13 = sld [smem:[#allocation6_spill]] }
 0x964   : > { %p2665_p11 = scmp.ge.s32.totalorder %s3707_s20, 2 }
 0x965   : > { %s2113_s0 = sand.u32 1, %s3708_s13  }
 0x966   : > { %p2662_p12 = pnand %p2665_p11, %p3080_p9  ;;  %s2114_s3 = scalar_lea.sflag [#allocation4], %s2113_s0 }
 0x968   : > { %p2663_p13 = pneg %p2662_p12 }
 0x96a   : > { %2913 = dma.done.wait (%p2663_p13), %s2114_s3, 256  }
 0x96b   : > { %2915 = vsyncadd (%p2663_p13), %s2114_s3, 4294967040  ;;  %s25_s28 = sadd.s32 1, %s3707_s20   ;;  %s3710_s21 = sld [smem:[#allocation7_spill]] }
 0x96c   : > { %p22_p0 = scmp.ge.s32.totalorder %s25_s28, 6   ;;  %s3711_s22 = sld [smem:[#allocation8_spill]] }
 0x96d   : > { %s3712_s23 = sld [smem:[#allocation18_spill]] }
 0x96e   : > { %s3713_s24 = sld [smem:[#allocation11_spill]]  ;;  %24 = sbr.rel (!%p22_p0) target bundleno = 11 (0xb), region = 141 }
 0x96f   : > { %s3714_s25 = sld [smem:[#allocation12_spill]] }
 0x970   : > { %s3715_s26 = sld [smem:[#allocation14_spill]] }
 0x971   : > { %s3716_s27 = sld [smem:[#allocation16_spill]] }
 0x973   :  { %2120 = vsyncpa [#allocation4], 1 }
 0x974   :  { %2122 = vsyncpa [#allocation4 + $0x1], 1 }

</bundles_post_ra>
